<compile_context>
chip_gen: v7x
topology: tpu7x:2x2x1
jax: 0.10.0
libtpu: 0.0.40
codegen_flags: <defaults>
</compile_context>

<pallas_src>
import functools
import math

import jax
import jax.numpy as jnp
from jax.experimental import pallas as pl
from jax.experimental.pallas import tpu as pltpu


# ----------------------------- kernel ---------------------------------------

def _layernorm(x, g, b, eps=1e-5):
    mu = jnp.mean(x, axis=-1, keepdims=True)
    var = jnp.mean(jnp.square(x - mu), axis=-1, keepdims=True)
    return (x - mu) * jax.lax.rsqrt(var + eps) * g + b


def fused_forward_kernel(x_ref, mask_ref,
                         wqkv_ref, bqkv_ref, wo_ref, bo_ref,
                         ln1g_ref, ln1b_ref, ln2g_ref, ln2b_ref,
                         w1_ref, b1_ref, w2_ref, b2_ref,
                         wout_ref, bout_ref,
                         logits_ref,
                         h_ref,
                         *, num_heads):
    """One grid step = one nn.TransformerEncoderLayer (norm_first=True, relu FFN).

    Activations are the flattened (B*S, D) matrix, carried across grid steps in
    the VMEM scratch `h_ref`.  At the last layer the vocab projection is fused.
    """
    layer = pl.program_id(0)
    n_layers = pl.num_programs(0)

    # Seed the activation scratch from the embeddings on the first layer step.
    @pl.when(layer == 0)
    def _():
        h_ref[...] = x_ref[...].astype(jnp.float32)

    x = h_ref[...]                          # (M, D), M = B*S
    M, D = x.shape
    hd = D // num_heads
    scale = 1.0 / math.sqrt(hd)
    mask = mask_ref[...]                    # (M, M) additive: 0 allowed, -1e30 masked

    # --- self-attention block (pre-LN) ---
    h = _layernorm(x, ln1g_ref[...], ln1b_ref[...])
    qkv = jnp.dot(h, wqkv_ref[...], preferred_element_type=jnp.float32) + bqkv_ref[...]
    q = qkv[:, :D]
    k = qkv[:, D:2 * D]
    v = qkv[:, 2 * D:]

    def split_heads(m):                     # (M, D) -> (H, M, hd) via column slices
        return jnp.stack(
            [m[:, i * hd:(i + 1) * hd] for i in range(num_heads)], axis=0)

    q3, k3, v3 = split_heads(q), split_heads(k), split_heads(v)

    # scores: batched over heads, contracting head_dim -> (H, M, M)
    s = jax.lax.dot_general(q3, k3, (((2,), (2,)), ((0,), (0,))),
                            preferred_element_type=jnp.float32) * scale
    s = s + mask[None, :, :]                # causal + same-batch mask
    s = s - jnp.max(s, axis=-1, keepdims=True)
    p = jnp.exp(s)
    p = p * pl.reciprocal(jnp.sum(p, axis=-1, keepdims=True), approx=True)

    # attn: (H, M, M) x (H, M, hd) -> (H, M, hd)
    a3 = jax.lax.dot_general(p, v3, (((2,), (1,)), ((0,), (0,))),
                             preferred_element_type=jnp.float32)
    attn = jnp.concatenate([a3[i] for i in range(num_heads)], axis=1)   # (M, D)
    attn = jnp.dot(attn, wo_ref[...], preferred_element_type=jnp.float32) + bo_ref[...]
    x = x + attn                            # residual (dropout = identity in eval)

    # --- feed-forward block (pre-LN) ---
    h2 = _layernorm(x, ln2g_ref[...], ln2b_ref[...])
    ff = jnp.dot(h2, w1_ref[...], preferred_element_type=jnp.float32) + b1_ref[...]
    ff = jnp.maximum(ff, 0.0)               # relu (TransformerEncoderLayer default)
    ff = jnp.dot(ff, w2_ref[...], preferred_element_type=jnp.float32) + b2_ref[...]
    x = x + ff                              # residual

    h_ref[...] = x

    # --- fused vocab projection on the final layer step (lane-dense V) ---
    @pl.when(layer == n_layers - 1)
    def _():
        logits_ref[...] = (jnp.dot(x, wout_ref[...],
                                   preferred_element_type=jnp.float32)
                           + bout_ref[...]).astype(logits_ref.dtype)

    # TODO(synk): for realistic S (>=512) restructure attention as an online-
    # softmax loop over KV tiles and tile the vocab projection over V so the
    # kernel fits v7x's 64 MiB VMEM; not needed at these toy shapes.


# ----------------------------- wrapper --------------------------------------

_LAYER_KEYS = ('wqkv', 'bqkv', 'wo', 'bo',
               'ln1_g', 'ln1_b', 'ln2_g', 'ln2_b',
               'w1', 'b1', 'w2', 'b2')


def forward(input_ids, params, num_heads):
    """Equivalent of HealthcareAutoregressiveLM.forward (eval mode)."""
    B, S = input_ids.shape
    D = params['token_embedding'].shape[1]
    V = params['w_out'].shape[1]
    L = params['wqkv'].shape[0]
    M = B * S

    # Embedding gathers + position add are plain-JAX glue (no clean BlockSpec
    # form for a gather); dropout is identity in eval.
    tok = params['token_embedding'][input_ids]              # (B, S, D)
    pos = params['position_embedding'][:S][None, :, :]      # (1, S, D)
    x = (tok + pos).astype(jnp.float32).reshape(M, D)
    # TODO(synk): training-mode dropout not implemented (eval semantics only).

    # Additive attention mask over the flattened batch*seq axis:
    # allowed iff same batch element AND key position <= query position.
    idx = jnp.arange(M, dtype=jnp.int32)
    qb, qs = idx // S, idx % S
    allowed = (qb[:, None] == qb[None, :]) & (qs[None, :] <= qs[:, None])
    mask = jnp.where(allowed, 0.0, -1e30).astype(jnp.float32)

    # Stacked per-layer weights: block = one layer, prefetched along the grid.
    layer_specs = [
        pl.BlockSpec((None,) + params[k].shape[1:], lambda l: (l, 0, 0))
        for k in _LAYER_KEYS
    ]
    # Replicated (constant-index) inputs stay resident across the layer grid.
    const2 = lambda l: (0, 0)
    in_specs = ([pl.BlockSpec((M, D), const2),          # embeddings
                 pl.BlockSpec((M, M), const2)]          # additive mask
                + layer_specs
                + [pl.BlockSpec((D, V), const2),        # w_out
                   pl.BlockSpec((1, V), const2)])       # b_out

    logits = pl.pallas_call(
        functools.partial(fused_forward_kernel, num_heads=num_heads),
        out_shape=jax.ShapeDtypeStruct((M, V), jnp.float32),
        grid=(L,),
        in_specs=in_specs,
        out_specs=pl.BlockSpec((M, V), const2),
        scratch_shapes=[pltpu.VMEM((M, D), jnp.float32)],
        compiler_params=pltpu.CompilerParams(
            dimension_semantics=("arbitrary",)),        # layers are sequential
    )(x, mask, *[params[k] for k in _LAYER_KEYS],
      params['w_out'], params['b_out'])

    return logits.reshape(B, S, V)


# ----------------------------- parameter init --------------------------------

def init_params(key, vocab_size, embedding_dim, hidden_dim, num_layers, max_seq_len):
    """Deterministic synthetic init: N(0, 0.02) weights, zero biases, LN = (1, 0).

    Per-layer weights are stacked along a leading layer axis, stored as
    [in_features, out_features] so every kernel matmul is `x @ W + b`.
    """
    D, H, L = embedding_dim, hidden_dim, num_layers
    keys = iter(jax.random.split(key, 3 + 4 * num_layers))

    def nrm(shape):
        return (jax.random.normal(next(keys), shape) * 0.02).astype(jnp.float32)

    params = {
        'token_embedding': nrm((vocab_size, D)),
        'position_embedding': nrm((max_seq_len, D)),
        'wqkv': jnp.stack([nrm((D, 3 * D)) for _ in range(L)]),
        'bqkv': jnp.zeros((L, 1, 3 * D), jnp.float32),
        'wo': jnp.stack([nrm((D, D)) for _ in range(L)]),
        'bo': jnp.zeros((L, 1, D), jnp.float32),
        'ln1_g': jnp.ones((L, 1, D), jnp.float32),
        'ln1_b': jnp.zeros((L, 1, D), jnp.float32),
        'ln2_g': jnp.ones((L, 1, D), jnp.float32),
        'ln2_b': jnp.zeros((L, 1, D), jnp.float32),
        'w1': jnp.stack([nrm((D, H)) for _ in range(L)]),
        'w2': jnp.stack([nrm((H, D)) for _ in range(L)]),
        'b1': jnp.zeros((L, 1, H), jnp.float32),
        'b2': jnp.zeros((L, 1, D), jnp.float32),
        'w_out': nrm((D, vocab_size)),
        'b_out': jnp.zeros((1, vocab_size), jnp.float32),
    }
    return params


# ----------------------------- main ------------------------------------------

if __name__ == "__main__":
    VOCAB_SIZE = 128
    EMBEDDING_DIM = 64
    HIDDEN_DIM = 128
    NUM_HEADS = 4
    NUM_LAYERS = 2
    MAX_SEQ_LEN = 16
    BATCH, SEQ = 2, 8

    root = jax.random.PRNGKey(0)
    k_tok, k_par = jax.random.split(root)
    input_ids = jax.random.randint(k_tok, (BATCH, SEQ), 0, VOCAB_SIZE, dtype=jnp.int32)
    params = init_params(k_par, VOCAB_SIZE, EMBEDDING_DIM, HIDDEN_DIM,
                         NUM_LAYERS, MAX_SEQ_LEN)

    fwd = jax.jit(functools.partial(forward, num_heads=NUM_HEADS))
    logits = fwd(input_ids, params)
    logits = jax.block_until_ready(logits)

    assert logits.shape == (BATCH, SEQ, VOCAB_SIZE), logits.shape
    assert bool(jnp.all(jnp.isfinite(logits)))
    print("KERNEL_OK")
</pallas_src>

<mosaic_0001>
module attributes {stable_mosaic.version = 11 : i64} {
  func.func @fused_forward_kernel(%arg0: i32, %arg1: memref<16x64xf32, #tpu.memory_space<vmem>>, %arg2: memref<16x16xf32, #tpu.memory_space<vmem>>, %arg3: memref<1x64x192xf32, #tpu.memory_space<vmem>>, %arg4: memref<1x1x192xf32, #tpu.memory_space<vmem>>, %arg5: memref<1x64x64xf32, #tpu.memory_space<vmem>>, %arg6: memref<1x1x64xf32, #tpu.memory_space<vmem>>, %arg7: memref<1x1x64xf32, #tpu.memory_space<vmem>>, %arg8: memref<1x1x64xf32, #tpu.memory_space<vmem>>, %arg9: memref<1x1x64xf32, #tpu.memory_space<vmem>>, %arg10: memref<1x1x64xf32, #tpu.memory_space<vmem>>, %arg11: memref<1x64x128xf32, #tpu.memory_space<vmem>>, %arg12: memref<1x1x128xf32, #tpu.memory_space<vmem>>, %arg13: memref<1x128x64xf32, #tpu.memory_space<vmem>>, %arg14: memref<1x1x64xf32, #tpu.memory_space<vmem>>, %arg15: memref<64x128xf32, #tpu.memory_space<vmem>>, %arg16: memref<1x128xf32, #tpu.memory_space<vmem>>, %arg17: memref<16x128xf32, #tpu.memory_space<vmem>>, %arg18: memref<16x64xf32, #tpu.memory_space<vmem>>) attributes {dimension_semantics = [#tpu.dimension_semantics<arbitrary>], iteration_bounds = array<i64: 2>, scalar_prefetch = 0 : i64, scratch_operands = 1 : i64, tpu.core_type = #tpu.core_type<tc>, window_params = [{pipeline_mode = #tpu.pipeline_mode<synchronous>, transform_indices = @transform_0, window_bounds = array<i64: 16, 64>}, {pipeline_mode = #tpu.pipeline_mode<synchronous>, transform_indices = @transform_1, window_bounds = array<i64: 16, 16>}, {transform_indices = @transform_2, window_bounds = array<i64: 1, 64, 192>}, {transform_indices = @transform_3, window_bounds = array<i64: 1, 1, 192>}, {transform_indices = @transform_4, window_bounds = array<i64: 1, 64, 64>}, {transform_indices = @transform_5, window_bounds = array<i64: 1, 1, 64>}, {transform_indices = @transform_6, window_bounds = array<i64: 1, 1, 64>}, {transform_indices = @transform_7, window_bounds = array<i64: 1, 1, 64>}, {transform_indices = @transform_8, window_bounds = array<i64: 1, 1, 64>}, {transform_indices = @transform_9, window_bounds = array<i64: 1, 1, 64>}, {transform_indices = @transform_10, window_bounds = array<i64: 1, 64, 128>}, {transform_indices = @transform_11, window_bounds = array<i64: 1, 1, 128>}, {transform_indices = @transform_12, window_bounds = array<i64: 1, 128, 64>}, {transform_indices = @transform_13, window_bounds = array<i64: 1, 1, 64>}, {pipeline_mode = #tpu.pipeline_mode<synchronous>, transform_indices = @transform_14, window_bounds = array<i64: 64, 128>}, {pipeline_mode = #tpu.pipeline_mode<synchronous>, transform_indices = @transform_15, window_bounds = array<i64: 1, 128>}, {pipeline_mode = #tpu.pipeline_mode<synchronous>, transform_indices = @transform_16, window_bounds = array<i64: 16, 128>}]} {
    %c0_i32 = arith.constant 0 : i32
    %0 = arith.cmpi eq, %arg0, %c0_i32 : i32
    %1 = arith.extui %0 : i1 to i32
    %c0_i32_0 = arith.constant 0 : i32
    %2 = arith.cmpi ne, %1, %c0_i32_0 : i32
    scf.if %2 {
      %c0_62 = arith.constant 0 : index
      %c0_63 = arith.constant 0 : index
      %149 = vector.load %arg1[%c0_62, %c0_63] : memref<16x64xf32, #tpu.memory_space<vmem>>, vector<16x64xf32>
      %c0_64 = arith.constant 0 : index
      %c0_65 = arith.constant 0 : index
      %150 = vector.load %arg18[%c0_64, %c0_65] : memref<16x64xf32, #tpu.memory_space<vmem>>, vector<16x64xf32>
      tpu.vector_store %arg18[%c0_64, %c0_65], %149 {strides = array<i32>} : memref<16x64xf32, #tpu.memory_space<vmem>>, vector<16x64xf32>,
    } else {
    }
    %c0 = arith.constant 0 : index
    %c0_1 = arith.constant 0 : index
    %3 = vector.load %arg18[%c0, %c0_1] : memref<16x64xf32, #tpu.memory_space<vmem>>, vector<16x64xf32>
    %c0_2 = arith.constant 0 : index
    %c0_3 = arith.constant 0 : index
    %4 = vector.load %arg2[%c0_2, %c0_3] : memref<16x16xf32, #tpu.memory_space<vmem>>, vector<16x16xf32>
    %c0_4 = arith.constant 0 : index
    %c0_5 = arith.constant 0 : index
    %c0_6 = arith.constant 0 : index
    %5 = vector.load %arg7[%c0_4, %c0_5, %c0_6] : memref<1x1x64xf32, #tpu.memory_space<vmem>>, vector<1x1x64xf32>
    %6 = vector.shape_cast %5 : vector<1x1x64xf32> to vector<1x64xf32>
    %c0_7 = arith.constant 0 : index
    %c0_8 = arith.constant 0 : index
    %c0_9 = arith.constant 0 : index
    %7 = vector.load %arg8[%c0_7, %c0_8, %c0_9] : memref<1x1x64xf32, #tpu.memory_space<vmem>>, vector<1x1x64xf32>
    %8 = vector.shape_cast %7 : vector<1x1x64xf32> to vector<1x64xf32>
    %cst = arith.constant dense<0.000000e+00> : vector<16xf32>
    %9 = vector.multi_reduction <add>, %3, %cst [1] : vector<16x64xf32> to vector<16xf32>
    %10 = vector.shape_cast %9 : vector<16xf32> to vector<16x1xf32>
    %cst_10 = arith.constant 6.400000e+01 : f32
    %11 = vector.broadcast %cst_10 : f32 to vector<16x1xf32>
    %12 = arith.divf %10, %11 : vector<16x1xf32>
    %13 = vector.broadcast %12 : vector<16x1xf32> to vector<16x64xf32>
    %14 = arith.subf %3, %13 : vector<16x64xf32>
    %15 = arith.mulf %14, %14 : vector<16x64xf32>
    %cst_11 = arith.constant dense<0.000000e+00> : vector<16xf32>
    %16 = vector.multi_reduction <add>, %15, %cst_11 [1] : vector<16x64xf32> to vector<16xf32>
    %17 = vector.shape_cast %16 : vector<16xf32> to vector<16x1xf32>
    %cst_12 = arith.constant 6.400000e+01 : f32
    %18 = vector.broadcast %cst_12 : f32 to vector<16x1xf32>
    %19 = arith.divf %17, %18 : vector<16x1xf32>
    %20 = vector.broadcast %12 : vector<16x1xf32> to vector<16x64xf32>
    %21 = arith.subf %3, %20 : vector<16x64xf32>
    %cst_13 = arith.constant 9.99999974E-6 : f32
    %22 = vector.broadcast %cst_13 : f32 to vector<16x1xf32>
    %23 = arith.addf %19, %22 : vector<16x1xf32>
    %24 = math.rsqrt %23 : vector<16x1xf32>
    %25 = vector.broadcast %24 : vector<16x1xf32> to vector<16x64xf32>
    %26 = arith.mulf %21, %25 : vector<16x64xf32>
    %27 = vector.broadcast %6 : vector<1x64xf32> to vector<16x64xf32>
    %28 = arith.mulf %26, %27 : vector<16x64xf32>
    %29 = vector.broadcast %8 : vector<1x64xf32> to vector<16x64xf32>
    %30 = arith.addf %28, %29 : vector<16x64xf32>
    %c0_14 = arith.constant 0 : index
    %c0_15 = arith.constant 0 : index
    %c0_16 = arith.constant 0 : index
    %31 = vector.load %arg3[%c0_14, %c0_15, %c0_16] : memref<1x64x192xf32, #tpu.memory_space<vmem>>, vector<1x64x192xf32>
    %32 = vector.shape_cast %31 : vector<1x64x192xf32> to vector<64x192xf32>
    %cst_17 = arith.constant dense<0.000000e+00> : vector<16x192xf32>
    %33 = tpu.matmul %30, %32, %cst_17 {dimension_numbers = #tpu.dot_dimension_numbers<[1], [0], [0], [1], [0, 0, 1, 1], [], []>} : vector<16x64xf32>, vector<64x192xf32>, vector<16x192xf32> -> vector<16x192xf32>
    %c0_18 = arith.constant 0 : index
    %c0_19 = arith.constant 0 : index
    %c0_20 = arith.constant 0 : index
    %34 = vector.load %arg4[%c0_18, %c0_19, %c0_20] : memref<1x1x192xf32, #tpu.memory_space<vmem>>, vector<1x1x192xf32>
    %35 = vector.shape_cast %34 : vector<1x1x192xf32> to vector<1x192xf32>
    %36 = vector.broadcast %35 : vector<1x192xf32> to vector<16x192xf32>
    %37 = arith.addf %33, %36 : vector<16x192xf32>
    %38 = vector.extract_strided_slice %37 {offsets = [0, 0], sizes = [16, 64], strides = [1, 1]} : vector<16x192xf32> to vector<16x64xf32>
    %39 = vector.extract_strided_slice %37 {offsets = [0, 64], sizes = [16, 64], strides = [1, 1]} : vector<16x192xf32> to vector<16x64xf32>
    %40 = vector.extract_strided_slice %37 {offsets = [0, 128], sizes = [16, 64], strides = [1, 1]} : vector<16x192xf32> to vector<16x64xf32>
    %41 = vector.extract_strided_slice %38 {offsets = [0, 0], sizes = [16, 16], strides = [1, 1]} : vector<16x64xf32> to vector<16x16xf32>
    %42 = vector.extract_strided_slice %38 {offsets = [0, 16], sizes = [16, 16], strides = [1, 1]} : vector<16x64xf32> to vector<16x16xf32>
    %43 = vector.extract_strided_slice %38 {offsets = [0, 32], sizes = [16, 16], strides = [1, 1]} : vector<16x64xf32> to vector<16x16xf32>
    %44 = vector.extract_strided_slice %38 {offsets = [0, 48], sizes = [16, 16], strides = [1, 1]} : vector<16x64xf32> to vector<16x16xf32>
    %45 = vector.shape_cast %41 : vector<16x16xf32> to vector<1x16x16xf32>
    %46 = vector.shape_cast %42 : vector<16x16xf32> to vector<1x16x16xf32>
    %47 = vector.shape_cast %43 : vector<16x16xf32> to vector<1x16x16xf32>
    %48 = vector.shape_cast %44 : vector<16x16xf32> to vector<1x16x16xf32>
    %49 = tpu.concatenate %45, %46, %47, %48 in 0 : vector<1x16x16xf32>, vector<1x16x16xf32>, vector<1x16x16xf32>, vector<1x16x16xf32> -> vector<4x16x16xf32>
    %50 = vector.extract_strided_slice %39 {offsets = [0, 0], sizes = [16, 16], strides = [1, 1]} : vector<16x64xf32> to vector<16x16xf32>
    %51 = vector.extract_strided_slice %39 {offsets = [0, 16], sizes = [16, 16], strides = [1, 1]} : vector<16x64xf32> to vector<16x16xf32>
    %52 = vector.extract_strided_slice %39 {offsets = [0, 32], sizes = [16, 16], strides = [1, 1]} : vector<16x64xf32> to vector<16x16xf32>
    %53 = vector.extract_strided_slice %39 {offsets = [0, 48], sizes = [16, 16], strides = [1, 1]} : vector<16x64xf32> to vector<16x16xf32>
    %54 = vector.shape_cast %50 : vector<16x16xf32> to vector<1x16x16xf32>
    %55 = vector.shape_cast %51 : vector<16x16xf32> to vector<1x16x16xf32>
    %56 = vector.shape_cast %52 : vector<16x16xf32> to vector<1x16x16xf32>
    %57 = vector.shape_cast %53 : vector<16x16xf32> to vector<1x16x16xf32>
    %58 = tpu.concatenate %54, %55, %56, %57 in 0 : vector<1x16x16xf32>, vector<1x16x16xf32>, vector<1x16x16xf32>, vector<1x16x16xf32> -> vector<4x16x16xf32>
    %59 = vector.extract_strided_slice %40 {offsets = [0, 0], sizes = [16, 16], strides = [1, 1]} : vector<16x64xf32> to vector<16x16xf32>
    %60 = vector.extract_strided_slice %40 {offsets = [0, 16], sizes = [16, 16], strides = [1, 1]} : vector<16x64xf32> to vector<16x16xf32>
    %61 = vector.extract_strided_slice %40 {offsets = [0, 32], sizes = [16, 16], strides = [1, 1]} : vector<16x64xf32> to vector<16x16xf32>
    %62 = vector.extract_strided_slice %40 {offsets = [0, 48], sizes = [16, 16], strides = [1, 1]} : vector<16x64xf32> to vector<16x16xf32>
    %63 = vector.shape_cast %59 : vector<16x16xf32> to vector<1x16x16xf32>
    %64 = vector.shape_cast %60 : vector<16x16xf32> to vector<1x16x16xf32>
    %65 = vector.shape_cast %61 : vector<16x16xf32> to vector<1x16x16xf32>
    %66 = vector.shape_cast %62 : vector<16x16xf32> to vector<1x16x16xf32>
    %67 = tpu.concatenate %63, %64, %65, %66 in 0 : vector<1x16x16xf32>, vector<1x16x16xf32>, vector<1x16x16xf32>, vector<1x16x16xf32> -> vector<4x16x16xf32>
    %cst_21 = arith.constant dense<0.000000e+00> : vector<4x16x16xf32>
    %68 = tpu.matmul %49, %58, %cst_21 {dimension_numbers = #tpu.dot_dimension_numbers<[2], [2], [1], [1], [0, 0, 0, 1, 1, 1], [0], [0]>} : vector<4x16x16xf32>, vector<4x16x16xf32>, vector<4x16x16xf32> -> vector<4x16x16xf32>
    %cst_22 = arith.constant 2.500000e-01 : f32
    %69 = vector.broadcast %cst_22 : f32 to vector<4x16x16xf32>
    %70 = arith.mulf %68, %69 : vector<4x16x16xf32>
    %71 = vector.shape_cast %4 : vector<16x16xf32> to vector<1x16x16xf32>
    %72 = vector.broadcast %71 : vector<1x16x16xf32> to vector<4x16x16xf32>
    %73 = arith.addf %70, %72 : vector<4x16x16xf32>
    %cst_23 = arith.constant dense<0xFF800000> : vector<4x16xf32>
    %74 = vector.multi_reduction <maximumf>, %73, %cst_23 [2] : vector<4x16x16xf32> to vector<4x16xf32>
    %75 = vector.shape_cast %74 : vector<4x16xf32> to vector<4x16x1xf32>
    %76 = vector.broadcast %75 : vector<4x16x1xf32> to vector<4x16x16xf32>
    %77 = arith.subf %73, %76 : vector<4x16x16xf32>
    %78 = math.exp %77 : vector<4x16x16xf32>
    %cst_24 = arith.constant dense<0.000000e+00> : vector<4x16xf32>
    %79 = vector.multi_reduction <add>, %78, %cst_24 [2] : vector<4x16x16xf32> to vector<4x16xf32>
    %80 = vector.shape_cast %79 : vector<4x16xf32> to vector<4x16x1xf32>
    %81 = tpu.reciprocal %80 {approx = true} : vector<4x16x1xf32> -> vector<4x16x1xf32>
    %82 = vector.broadcast %81 : vector<4x16x1xf32> to vector<4x16x16xf32>
    %83 = arith.mulf %78, %82 : vector<4x16x16xf32>
    %cst_25 = arith.constant dense<0.000000e+00> : vector<4x16x16xf32>
    %84 = tpu.matmul %83, %67, %cst_25 {dimension_numbers = #tpu.dot_dimension_numbers<[2], [1], [1], [2], [0, 0, 0, 1, 1, 2], [0], [0]>} : vector<4x16x16xf32>, vector<4x16x16xf32>, vector<4x16x16xf32> -> vector<4x16x16xf32>
    %85 = vector.extract_strided_slice %84 {offsets = [0, 0, 0], sizes = [1, 16, 16], strides = [1, 1, 1]} : vector<4x16x16xf32> to vector<1x16x16xf32>
    %86 = vector.shape_cast %85 : vector<1x16x16xf32> to vector<16x16xf32>
    %87 = vector.extract_strided_slice %84 {offsets = [1, 0, 0], sizes = [1, 16, 16], strides = [1, 1, 1]} : vector<4x16x16xf32> to vector<1x16x16xf32>
    %88 = vector.shape_cast %87 : vector<1x16x16xf32> to vector<16x16xf32>
    %89 = vector.extract_strided_slice %84 {offsets = [2, 0, 0], sizes = [1, 16, 16], strides = [1, 1, 1]} : vector<4x16x16xf32> to vector<1x16x16xf32>
    %90 = vector.shape_cast %89 : vector<1x16x16xf32> to vector<16x16xf32>
    %91 = vector.extract_strided_slice %84 {offsets = [3, 0, 0], sizes = [1, 16, 16], strides = [1, 1, 1]} : vector<4x16x16xf32> to vector<1x16x16xf32>
    %92 = vector.shape_cast %91 : vector<1x16x16xf32> to vector<16x16xf32>
    %93 = tpu.concatenate %86, %88, %90, %92 in 1 : vector<16x16xf32>, vector<16x16xf32>, vector<16x16xf32>, vector<16x16xf32> -> vector<16x64xf32>
    %c0_26 = arith.constant 0 : index
    %c0_27 = arith.constant 0 : index
    %c0_28 = arith.constant 0 : index
    %94 = vector.load %arg5[%c0_26, %c0_27, %c0_28] : memref<1x64x64xf32, #tpu.memory_space<vmem>>, vector<1x64x64xf32>
    %95 = vector.shape_cast %94 : vector<1x64x64xf32> to vector<64x64xf32>
    %cst_29 = arith.constant dense<0.000000e+00> : vector<16x64xf32>
    %96 = tpu.matmul %93, %95, %cst_29 {dimension_numbers = #tpu.dot_dimension_numbers<[1], [0], [0], [1], [0, 0, 1, 1], [], []>} : vector<16x64xf32>, vector<64x64xf32>, vector<16x64xf32> -> vector<16x64xf32>
    %c0_30 = arith.constant 0 : index
    %c0_31 = arith.constant 0 : index
    %c0_32 = arith.constant 0 : index
    %97 = vector.load %arg6[%c0_30, %c0_31, %c0_32] : memref<1x1x64xf32, #tpu.memory_space<vmem>>, vector<1x1x64xf32>
    %98 = vector.shape_cast %97 : vector<1x1x64xf32> to vector<1x64xf32>
    %99 = vector.broadcast %98 : vector<1x64xf32> to vector<16x64xf32>
    %100 = arith.addf %96, %99 : vector<16x64xf32>
    %101 = arith.addf %3, %100 : vector<16x64xf32>
    %c0_33 = arith.constant 0 : index
    %c0_34 = arith.constant 0 : index
    %c0_35 = arith.constant 0 : index
    %102 = vector.load %arg9[%c0_33, %c0_34, %c0_35] : memref<1x1x64xf32, #tpu.memory_space<vmem>>, vector<1x1x64xf32>
    %103 = vector.shape_cast %102 : vector<1x1x64xf32> to vector<1x64xf32>
    %c0_36 = arith.constant 0 : index
    %c0_37 = arith.constant 0 : index
    %c0_38 = arith.constant 0 : index
    %104 = vector.load %arg10[%c0_36, %c0_37, %c0_38] : memref<1x1x64xf32, #tpu.memory_space<vmem>>, vector<1x1x64xf32>
    %105 = vector.shape_cast %104 : vector<1x1x64xf32> to vector<1x64xf32>
    %cst_39 = arith.constant dense<0.000000e+00> : vector<16xf32>
    %106 = vector.multi_reduction <add>, %101, %cst_39 [1] : vector<16x64xf32> to vector<16xf32>
    %107 = vector.shape_cast %106 : vector<16xf32> to vector<16x1xf32>
    %cst_40 = arith.constant 6.400000e+01 : f32
    %108 = vector.broadcast %cst_40 : f32 to vector<16x1xf32>
    %109 = arith.divf %107, %108 : vector<16x1xf32>
    %110 = vector.broadcast %109 : vector<16x1xf32> to vector<16x64xf32>
    %111 = arith.subf %101, %110 : vector<16x64xf32>
    %112 = arith.mulf %111, %111 : vector<16x64xf32>
    %cst_41 = arith.constant dense<0.000000e+00> : vector<16xf32>
    %113 = vector.multi_reduction <add>, %112, %cst_41 [1] : vector<16x64xf32> to vector<16xf32>
    %114 = vector.shape_cast %113 : vector<16xf32> to vector<16x1xf32>
    %cst_42 = arith.constant 6.400000e+01 : f32
    %115 = vector.broadcast %cst_42 : f32 to vector<16x1xf32>
    %116 = arith.divf %114, %115 : vector<16x1xf32>
    %117 = vector.broadcast %109 : vector<16x1xf32> to vector<16x64xf32>
    %118 = arith.subf %101, %117 : vector<16x64xf32>
    %cst_43 = arith.constant 9.99999974E-6 : f32
    %119 = vector.broadcast %cst_43 : f32 to vector<16x1xf32>
    %120 = arith.addf %116, %119 : vector<16x1xf32>
    %121 = math.rsqrt %120 : vector<16x1xf32>
    %122 = vector.broadcast %121 : vector<16x1xf32> to vector<16x64xf32>
    %123 = arith.mulf %118, %122 : vector<16x64xf32>
    %124 = vector.broadcast %103 : vector<1x64xf32> to vector<16x64xf32>
    %125 = arith.mulf %123, %124 : vector<16x64xf32>
    %126 = vector.broadcast %105 : vector<1x64xf32> to vector<16x64xf32>
    %127 = arith.addf %125, %126 : vector<16x64xf32>
    %c0_44 = arith.constant 0 : index
    %c0_45 = arith.constant 0 : index
    %c0_46 = arith.constant 0 : index
    %128 = vector.load %arg11[%c0_44, %c0_45, %c0_46] : memref<1x64x128xf32, #tpu.memory_space<vmem>>, vector<1x64x128xf32>
    %129 = vector.shape_cast %128 : vector<1x64x128xf32> to vector<64x128xf32>
    %cst_47 = arith.constant dense<0.000000e+00> : vector<16x128xf32>
    %130 = tpu.matmul %127, %129, %cst_47 {dimension_numbers = #tpu.dot_dimension_numbers<[1], [0], [0], [1], [0, 0, 1, 1], [], []>} : vector<16x64xf32>, vector<64x128xf32>, vector<16x128xf32> -> vector<16x128xf32>
    %c0_48 = arith.constant 0 : index
    %c0_49 = arith.constant 0 : index
    %c0_50 = arith.constant 0 : index
    %131 = vector.load %arg12[%c0_48, %c0_49, %c0_50] : memref<1x1x128xf32, #tpu.memory_space<vmem>>, vector<1x1x128xf32>
    %132 = vector.shape_cast %131 : vector<1x1x128xf32> to vector<1x128xf32>
    %133 = vector.broadcast %132 : vector<1x128xf32> to vector<16x128xf32>
    %134 = arith.addf %130, %133 : vector<16x128xf32>
    %cst_51 = arith.constant 0.000000e+00 : f32
    %135 = vector.broadcast %cst_51 : f32 to vector<16x128xf32>
    %136 = arith.maximumf %134, %135 : vector<16x128xf32>
    %c0_52 = arith.constant 0 : index
    %c0_53 = arith.constant 0 : index
    %c0_54 = arith.constant 0 : index
    %137 = vector.load %arg13[%c0_52, %c0_53, %c0_54] : memref<1x128x64xf32, #tpu.memory_space<vmem>>, vector<1x128x64xf32>
    %138 = vector.shape_cast %137 : vector<1x128x64xf32> to vector<128x64xf32>
    %cst_55 = arith.constant dense<0.000000e+00> : vector<16x64xf32>
    %139 = tpu.matmul %136, %138, %cst_55 {dimension_numbers = #tpu.dot_dimension_numbers<[1], [0], [0], [1], [0, 0, 1, 1], [], []>} : vector<16x128xf32>, vector<128x64xf32>, vector<16x64xf32> -> vector<16x64xf32>
    %c0_56 = arith.constant 0 : index
    %c0_57 = arith.constant 0 : index
    %c0_58 = arith.constant 0 : index
    %140 = vector.load %arg14[%c0_56, %c0_57, %c0_58] : memref<1x1x64xf32, #tpu.memory_space<vmem>>, vector<1x1x64xf32>
    %141 = vector.shape_cast %140 : vector<1x1x64xf32> to vector<1x64xf32>
    %142 = vector.broadcast %141 : vector<1x64xf32> to vector<16x64xf32>
    %143 = arith.addf %139, %142 : vector<16x64xf32>
    %144 = arith.addf %101, %143 : vector<16x64xf32>
    %c0_59 = arith.constant 0 : index
    %c0_60 = arith.constant 0 : index
    %145 = vector.load %arg18[%c0_59, %c0_60] : memref<16x64xf32, #tpu.memory_space<vmem>>, vector<16x64xf32>
    tpu.vector_store %arg18[%c0_59, %c0_60], %144 {strides = array<i32>} : memref<16x64xf32, #tpu.memory_space<vmem>>, vector<16x64xf32>,
    %c1_i32 = arith.constant 1 : i32
    %146 = arith.cmpi eq, %arg0, %c1_i32 : i32
    %147 = arith.extui %146 : i1 to i32
    %c0_i32_61 = arith.constant 0 : i32
    %148 = arith.cmpi ne, %147, %c0_i32_61 : i32
    scf.if %148 {
      %c0_62 = arith.constant 0 : index
      %c0_63 = arith.constant 0 : index
      %149 = vector.load %arg15[%c0_62, %c0_63] : memref<64x128xf32, #tpu.memory_space<vmem>>, vector<64x128xf32>
      %cst_64 = arith.constant dense<0.000000e+00> : vector<16x128xf32>
      %150 = tpu.matmul %144, %149, %cst_64 {dimension_numbers = #tpu.dot_dimension_numbers<[1], [0], [0], [1], [0, 0, 1, 1], [], []>} : vector<16x64xf32>, vector<64x128xf32>, vector<16x128xf32> -> vector<16x128xf32>
      %c0_65 = arith.constant 0 : index
      %c0_66 = arith.constant 0 : index
      %151 = vector.load %arg16[%c0_65, %c0_66] : memref<1x128xf32, #tpu.memory_space<vmem>>, vector<1x128xf32>
      %152 = vector.broadcast %151 : vector<1x128xf32> to vector<16x128xf32>
      %153 = arith.addf %150, %152 : vector<16x128xf32>
      %c0_67 = arith.constant 0 : index
      %c0_68 = arith.constant 0 : index
      %154 = vector.load %arg17[%c0_67, %c0_68] : memref<16x128xf32, #tpu.memory_space<vmem>>, vector<16x128xf32>
      tpu.vector_store %arg17[%c0_67, %c0_68], %153 {strides = array<i32>} : memref<16x128xf32, #tpu.memory_space<vmem>>, vector<16x128xf32>,
    } else {
    }
    return
  }
  func.func @transform_0(%arg0: i32) -> (i32, i32) {
    %c0_i32 = arith.constant 0 : i32
    %c0_i32_0 = arith.constant 0 : i32
    %c0_i32_1 = arith.constant 0 : i32
    return %c0_i32, %c0_i32_0 : i32, i32
  }
  func.func @transform_1(%arg0: i32) -> (i32, i32) {
    %c0_i32 = arith.constant 0 : i32
    %c0_i32_0 = arith.constant 0 : i32
    %c0_i32_1 = arith.constant 0 : i32
    return %c0_i32, %c0_i32_0 : i32, i32
  }
  func.func @transform_2(%arg0: i32) -> (i32, i32, i32) {
    %c0_i32 = arith.constant 0 : i32
    %c0_i32_0 = arith.constant 0 : i32
    %c0_i32_1 = arith.constant 0 : i32
    return %arg0, %c0_i32, %c0_i32_0 : i32, i32, i32
  }
  func.func @transform_3(%arg0: i32) -> (i32, i32, i32) {
    %c0_i32 = arith.constant 0 : i32
    %c0_i32_0 = arith.constant 0 : i32
    %c0_i32_1 = arith.constant 0 : i32
    return %arg0, %c0_i32, %c0_i32_0 : i32, i32, i32
  }
  func.func @transform_4(%arg0: i32) -> (i32, i32, i32) {
    %c0_i32 = arith.constant 0 : i32
    %c0_i32_0 = arith.constant 0 : i32
    %c0_i32_1 = arith.constant 0 : i32
    return %arg0, %c0_i32, %c0_i32_0 : i32, i32, i32
  }
  func.func @transform_5(%arg0: i32) -> (i32, i32, i32) {
    %c0_i32 = arith.constant 0 : i32
    %c0_i32_0 = arith.constant 0 : i32
    %c0_i32_1 = arith.constant 0 : i32
    return %arg0, %c0_i32, %c0_i32_0 : i32, i32, i32
  }
  func.func @transform_6(%arg0: i32) -> (i32, i32, i32) {
    %c0_i32 = arith.constant 0 : i32
    %c0_i32_0 = arith.constant 0 : i32
    %c0_i32_1 = arith.constant 0 : i32
    return %arg0, %c0_i32, %c0_i32_0 : i32, i32, i32
  }
  func.func @transform_7(%arg0: i32) -> (i32, i32, i32) {
    %c0_i32 = arith.constant 0 : i32
    %c0_i32_0 = arith.constant 0 : i32
    %c0_i32_1 = arith.constant 0 : i32
    return %arg0, %c0_i32, %c0_i32_0 : i32, i32, i32
  }
  func.func @transform_8(%arg0: i32) -> (i32, i32, i32) {
    %c0_i32 = arith.constant 0 : i32
    %c0_i32_0 = arith.constant 0 : i32
    %c0_i32_1 = arith.constant 0 : i32
    return %arg0, %c0_i32, %c0_i32_0 : i32, i32, i32
  }
  func.func @transform_9(%arg0: i32) -> (i32, i32, i32) {
    %c0_i32 = arith.constant 0 : i32
    %c0_i32_0 = arith.constant 0 : i32
    %c0_i32_1 = arith.constant 0 : i32
    return %arg0, %c0_i32, %c0_i32_0 : i32, i32, i32
  }
  func.func @transform_10(%arg0: i32) -> (i32, i32, i32) {
    %c0_i32 = arith.constant 0 : i32
    %c0_i32_0 = arith.constant 0 : i32
    %c0_i32_1 = arith.constant 0 : i32
    return %arg0, %c0_i32, %c0_i32_0 : i32, i32, i32
  }
  func.func @transform_11(%arg0: i32) -> (i32, i32, i32) {
    %c0_i32 = arith.constant 0 : i32
    %c0_i32_0 = arith.constant 0 : i32
    %c0_i32_1 = arith.constant 0 : i32
    return %arg0, %c0_i32, %c0_i32_0 : i32, i32, i32
  }
  func.func @transform_12(%arg0: i32) -> (i32, i32, i32) {
    %c0_i32 = arith.constant 0 : i32
    %c0_i32_0 = arith.constant 0 : i32
    %c0_i32_1 = arith.constant 0 : i32
    return %arg0, %c0_i32, %c0_i32_0 : i32, i32, i32
  }
  func.func @transform_13(%arg0: i32) -> (i32, i32, i32) {
    %c0_i32 = arith.constant 0 : i32
    %c0_i32_0 = arith.constant 0 : i32
    %c0_i32_1 = arith.constant 0 : i32
    return %arg0, %c0_i32, %c0_i32_0 : i32, i32, i32
  }
  func.func @transform_14(%arg0: i32) -> (i32, i32) {
    %c0_i32 = arith.constant 0 : i32
    %c0_i32_0 = arith.constant 0 : i32
    %c0_i32_1 = arith.constant 0 : i32
    return %c0_i32, %c0_i32_0 : i32, i32
  }
  func.func @transform_15(%arg0: i32) -> (i32, i32) {
    %c0_i32 = arith.constant 0 : i32
    %c0_i32_0 = arith.constant 0 : i32
    %c0_i32_1 = arith.constant 0 : i32
    return %c0_i32, %c0_i32_0 : i32, i32
  }
  func.func @transform_16(%arg0: i32) -> (i32, i32) {
    %c0_i32 = arith.constant 0 : i32
    %c0_i32_0 = arith.constant 0 : i32
    %c0_i32_1 = arith.constant 0 : i32
    return %c0_i32, %c0_i32_0 : i32, i32
  }
}

</mosaic_0001>

<bundles_post_ra>
// kernel: forward.1
= control target key start
LH: loop header
LB: loop body
LE: loop exit
PB: predicated region body
PF: predicated region fallthrough
CT: control target
= control target key end

     0   :  { %s3307_s0 = inlined_call_operand.vmem [shape: f32[16,64], index: 0, kind: input, shape index: {}]   ;;  %s3308_s1 = inlined_call_operand.vmem [shape: f32[16,16], index: 1, kind: input, shape index: {}]   ;;  %s3309_s2 = inlined_call_operand.vmem [shape: f32[2,64,192], index: 2, kind: input, shape index: {}]   ;;  %s3310_s3 = inlined_call_operand.vmem [shape: f32[2,1,192], index: 3, kind: input, shape index: {}]   ;;  %s3311_s4 = inlined_call_operand.vmem [shape: f32[2,64,64], index: 4, kind: input, shape index: {}]   ;;  %s3312_s5 = inlined_call_operand.vmem [shape: f32[2,1,64], index: 5, kind: input, shape index: {}]   ;;  %s3313_s6 = inlined_call_operand.vmem [shape: f32[2,1,64], index: 6, kind: input, shape index: {}]   ;;  %s3314_s7 = inlined_call_operand.vmem [shape: f32[2,1,64], index: 7, kind: input, shape index: {}]   ;;  %s3315_s8 = inlined_call_operand.vmem [shape: f32[2,1,64], index: 8, kind: input, shape index: {}]   ;;  %s3316_s9 = inlined_call_operand.vmem [shape: f32[2,1,64], index: 9, kind: input, shape index: {}]   ;;  %s3317_s10 = inlined_call_operand.vmem [shape: f32[2,64,128], index: 10, kind: input, shape index: {}]   ;;  %s3318_s11 = inlined_call_operand.vmem [shape: f32[2,1,128], index: 11, kind: input, shape index: {}]   ;;  %s3319_s12 = inlined_call_operand.vmem [shape: f32[2,128,64], index: 12, kind: input, shape index: {}]   ;;  %s3320_s13 = inlined_call_operand.vmem [shape: f32[2,1,64], index: 13, kind: input, shape index: {}]   ;;  %s3321_s14 = inlined_call_operand.vmem [shape: f32[64,128], index: 14, kind: input, shape index: {}]   ;;  %s3322_s15 = inlined_call_operand.vmem [shape: f32[1,128], index: 15, kind: input, shape index: {}]   ;;  %s3323_s16 = inlined_call_operand.hbm [shape: f32[16,128], index: 16, kind: output, shape index: {}]  }
   0x1   :  { %3329 = sst [smem:[#allocation8_spill]] %s3307_s0 }
   0x2   :  { %3330 = sst [smem:[#allocation9_spill]] %s3308_s1 }
   0x3   :  { %3331 = sst [smem:[#allocation10_spill]] %s3309_s2 }
   0x4   :  { %3332 = sst [smem:[#allocation11_spill]] %s3310_s3 }
   0x5   :  { %3333 = sst [smem:[#allocation12_spill]] %s3311_s4 }
   0x6   :  { %3334 = sst [smem:[#allocation13_spill]] %s3321_s14 }
   0x7   :  { %3335 = sst [smem:[#allocation14_spill]] %s3322_s15 }
   0x8   :  { %3336 = sst [smem:[#allocation15_spill]] %s3323_s16 }
   0x9   :  { %21 = vsyncpa [#allocation4], 0  ;;  %s2960_s21 = smov 0  }
   0xa LB: > { %3337 = sst [smem:[#allocation6_spill]] %s2862_s21  ;;  %s2966_s22 = sadd.s32 4294967295, %s2862_s21   ;;  %s2862_s21 = sphi %s2960_s21, %s27_s21  }
   0xb   : > { %p2302_p0 = scmp.ge.s32.totalorder %s2862_s21, 1  ;;  %p553_p1 = scmp.lt.s32.totalorder %s2862_s21, 3 }
   0xd   : > { %p554_p2 = pnand %p2302_p0, %p553_p1 }
   0xf   : > { %557 = sbr.rel (%p554_p2) target bundleno = 2936 (0xb78), region = 84 }
  0x16   : > { %p638_p3 = scmp.lt.s32.totalorder %s2966_s22, 1  ;;  %s3338_s2 = sld [smem:[#allocation10_spill]] }
  0x17   : > { %s3339_s3 = sld [smem:[#allocation11_spill]]  ;;  %s3341_s4 = sld [smem:[#allocation12_spill]] }
  0x18   : > { %s2972_s23 = scalar_select %p638_p3, %s2966_s22, 1 }
  0x19   : > { %p2312_p4 = scmp.ne.s32.totalorder %s2966_s22, 0 }
  0x1a   : > { %s2358_s24 = sshll.u32 %s2972_s23, 7  ;;  %s2305_s25 = sshll.u32 %s2972_s23, 1  ;;  %vm689_vm0 = vcmask (!%p2312_p4), 523264  }
  0x1b   : > { %s2359_s17 = sshll.u32 %s2972_s23, 6  ;;  %s660_s29 = scalar_lea.vmem %s3314_s7, %s2972_s23 }
  0x1c   : > { %s2979_s28 = scalar_lea.vmem %s3338_s2, %s2358_s24  ;;  %s666_s19 = scalar_lea.vmem %s3316_s9, %s2972_s23 }
  0x1d   : > { %s2984_s0 = scalar_lea.vmem %s3339_s3, %s2305_s25  ;;  %s2994_s15 = scalar_lea.vmem %s3341_s4, %s2359_s17 }
  0x1e   : > { %3340 = sst [smem:[#allocation7_spill]] %s2984_s0  ;;  %s3015_s21 = scalar_lea.vmem %s3317_s10, %s2359_s17 }
  0x1f   : > { %s674_s14 = scalar_lea.vmem %s3318_s11, %s2972_s23  ;;  %s3024_s27 = scalar_lea.vmem %s3319_s12, %s2358_s24 }
  0x20   : > { %s682_s3 = scalar_lea.vmem %s3320_s13, %s2972_s23  ;;  %686 = sbr.rel (%p2312_p4) target bundleno = 41 (0x29), region = 88 }
  0x21   : > { %s3342_s17 = sld [smem:[#allocation8_spill]] (!%p2312_p4) }
  0x27   : > { %v687_v0 = vld [vmem:[%s3342_s17] sm:$0xff]  ;;  %v688_v1 = vld [vmem:[%s3342_s17 + $0x8] sm:$0xff] }
  0x28   : > { %690 = vst.msk [vmem:[#allocation2] sm:$0xff] %vm689_vm0, %v687_v0  ;;  %691 = vst.msk [vmem:[#allocation2 + $0x8] sm:$0xff] %vm689_vm0, %v688_v1 }
  0x29 PF: > { %vm698_vm1 = vcmask 523264   ;;  %v743_v16 = vld [vmem:[%s2979_s28 + $0x8] sm:$0xff]  ;;  %v745_v17 = vld [vmem:[%s2979_s28 + $0x18] sm:$0xff]  ;;  %v742_v19 = vld [vmem:[%s2979_s28] sm:$0xff]  ;;  %v2864_v35 = vmov 0.0   ;;  %s3343_s16 = scalar_lea.vmem %s3313_s6, %s2972_s23  ;;  %s3344_s1 = sld [smem:[#allocation7_spill]]  ;;  %v760_v57 = vlaneseq }
  0x2a   : > { %v2590_v18 = vpack.c.bf16 %v745_v17, %v743_v16  ;;  %v744_v20 = vld [vmem:[%s2979_s28 + $0x10] sm:$0xff]  ;;  %v747_v22 = vld [vmem:[%s2979_s28 + $0x28] sm:$0xff]  ;;  %v749_v23 = vld [vmem:[%s2979_s28 + $0x38] sm:$0xff]  ;;  %840 = vmatprep.mubr.f32.mxu1 %v2864_v35  ;;  %vm891_vm2 = vcmask 130048   ;;  %s2866_s25 = smov 96   ;;  %s2867_s30 = smov 80  }
  0x2b   : > { %v2592_v21 = vpack.c.bf16 %v744_v20, %v742_v19  ;;  %v2594_v24 = vpack.c.bf16 %v749_v23, %v747_v22  ;;  %v746_v25 = vld [vmem:[%s2979_s28 + $0x20] sm:$0xff]  ;;  %v748_v26 = vld [vmem:[%s2979_s28 + $0x30] sm:$0xff]  ;;  %v751_v28 = vld [vmem:[%s2979_s28 + $0x48] sm:$0xff]  ;;  %v761_v58 = vshrl.u32 %v760_v57, 7  ;;  %s2868_s0 = smov 64   ;;  %s3347_s4 = sld [smem:[#allocation9_spill]] }
  0x2c   : > { %2591 = vmatprep.subr.bf16.mxu1 %v2590_v18  ;;  %v2596_v27 = vpack.c.bf16 %v748_v26, %v746_v25  ;;  %v753_v29 = vld [vmem:[%s2979_s28 + $0x58] sm:$0xff]  ;;  %v750_v30 = vld [vmem:[%s2979_s28 + $0x40] sm:$0xff]  ;;  %v752_v32 = vld [vmem:[%s2979_s28 + $0x50] sm:$0xff]  ;;  %vm1690_vm4 = vcmask 261120   ;;  %vm1693_vm5 = vcmask 392192   ;;  %p2350_p5 = scmp.ne.s32.totalorder %s2966_s22, 1 }
  0x2d   : > { %2593 = vmatpush1.bf16.msra.mxu1 %v2592_v21  ;;  %v2598_v31 = vpack.c.bf16 %v753_v29, %v751_v28  ;;  %v755_v33 = vld [vmem:[%s2979_s28 + $0x68] sm:$0xff]  ;;  %v757_v34 = vld [vmem:[%s2979_s28 + $0x78] sm:$0xff]  ;;  %v2600_v36 = vpack.c.bf16 %v752_v32, %v750_v30  ;;  %v754_v38 = vld [vmem:[%s2979_s28 + $0x60] sm:$0xff]  ;;  %v762_v59 = vsub.s32 0, %v761_v58  ;;  %v766_v62 = vsub.s32 1, %v761_v58 }
  0x2e   : > { %2595 = vmatprep.subr.bf16.mxu1 %v2594_v24  ;;  %v2602_v37 = vpack.c.bf16 %v757_v34, %v755_v33  ;;  %v756_v39 = vld [vmem:[%s2979_s28 + $0x70] sm:$0xff]  ;;  %v2313_v48 = vld [vmem:[%s3343_s16] ss:$0 sm:$0xff]  ;;  %vm3090_vm3 = vmpackc.low %vm891_vm2, %vm891_vm2  ;;  %s2869_s16 = smov 16   ;;  %s2871_s28 = smov 48  }
  0x2f   : > { %v3037_v2 = vld [vmem:[#allocation2] sm:$0xff]  ;;  %v3039_v3 = vld [vmem:[#allocation2 + $0x8] sm:$0xff]  ;;  %v2604_v40 = vpack.c.bf16 %v756_v39, %v754_v38 }
  0x30   : > { %v699_v4 = vsel %vm698_vm1, %v3037_v2, 0.0  ;;  %v702_v5 = vsel %vm698_vm1, %v3039_v3, 0.0  ;;  %v2314_v50 = vld [vmem:[%s660_s29] ss:$0 sm:$0xff]  ;;  %s2865_s29 = smov 112  }
  0x31   : > { %700 = vadd.xlane.f32.xlu0 %v699_v4  ;;  %2597 = vmatpush1.bf16.msra.mxu1 %v2596_v27  ;;  %v758_v60 = vld [vmem:[%s3344_s1] sm:$0x3]  ;;  %s2870_s1 = smov 32  }
  0x32   : > { %2599 = vmatprep.subr.bf16.mxu1 %v2598_v31  ;;  %v763_v61 = vrot.slane %v758_v60, %v762_v59  ;;  %v767_v4 = vrot.slane %v758_v60, %v766_v62 }
  0x35   : > { %703 = vadd.xlane.f32.xlu0 %v702_v5  ;;  %2601 = vmatpush1.bf16.msra.mxu1 %v2600_v36 }
  0x36   : > { %2603 = vmatprep.subr.bf16.mxu1 %v2602_v37 }
  0x39   : > { %2605 = vmatpush1.bf16.msra.mxu1 %v2604_v40  ;;  %v695_v40 = vld [vmem:[%s3347_s4 + $0x8] sm:$0xff] }
  0xbe   : > { %v701_v6 = vpop.xlane.xlu0 %700 }
  0xbf   : > { %v706_v7 = vmul.f32 0.015625, %v701_v6 }
  0xc1   : > { %v708_v8 = vsub.f32 %v3037_v2, %v706_v7 }
  0xc2   : > { %v704_v9 = vpop.xlane.xlu0 %703 }
  0xc3   : > { %v707_v10 = vmul.f32 0.015625, %v704_v9  ;;  %v710_v11 = vmul.f32 %v708_v8, %v708_v8 }
  0xc5   : > { %v709_v12 = vsub.f32 %v3039_v3, %v707_v10  ;;  %v712_v13 = vsel %vm698_vm1, %v710_v11, 0.0 }
  0xc6   : > { %713 = vadd.xlane.f32.xlu1 %v712_v13 }
  0xc7   : > { %v711_v14 = vmul.f32 %v709_v12, %v709_v12 }
  0xc9   : > { %v715_v15 = vsel %vm698_vm1, %v711_v14, 0.0 }
  0xca   : > { %716 = vadd.xlane.f32.xlu1 %v715_v15 }
 0x153   : > { %v714_v41 = vpop.xlane.xlu1 %713 }
 0x154   : > { %v718_v42 = vmul.f32 0.015625, %v714_v41 }
 0x156   : > { %v720_v43 = vadd.f32 1e-05, %v718_v42 }
 0x157   : > { %v717_v44 = vpop.xlane.xlu1 %716 }
 0x158   : > { %2786 = vrsqrt.f32 %v720_v43  ;;  %v719_v45 = vmul.f32 0.015625, %v717_v44  ;;  %v694_v43 = vld [vmem:[%s3347_s4] sm:$0xff] }
 0x15a   : > { %v721_v46 = vadd.f32 1e-05, %v719_v45 }
 0x15c   : > { %2788 = vrsqrt.f32 %v721_v46 }
 0x162   : > { %v2787_v47 = vpop.eup %2786 }
 0x163   : > { %v724_v49 = vmul.f32 %v2787_v47, %v708_v8 }
 0x165   : > { %v732_v51 = vmul.f32 %v2313_v48, %v724_v49 }
 0x166   : > { %v2789_v52 = vpop.eup %2788 }
 0x167   : > { %v740_v53 = vadd.f32 %v2314_v50, %v732_v51  ;;  %v725_v54 = vmul.f32 %v2789_v52, %v709_v12 }
 0x169   : > { %2315 = vmatmul.mubr.msk.f32.vlgmr.msra.gmra.mrb[0].mxu1 %vm698_vm1, %v740_v53  ;;  %v733_v55 = vmul.f32 %v2313_v48, %v725_v54 }
 0x16a   : > { %846 = vmatprep.mubr.f32.mxu1 %v2864_v35 }
 0x16b   : > { %v741_v56 = vadd.f32 %v2314_v50, %v733_v55 }
 0x16d   : > { %2316 = vmatmul.mubr.msk.f32.gmra.mrb[2].mxu1 %vm698_vm1, %v741_v56 }
 0x23c   : > { %v842_v63 = vpop.f32.mrb[0].mxu1 }
 0x23d   : > { %v843_v0 = vadd.f32 %v842_v63, %v763_v61  ;;  %v844_v1 = vpop.f32.mrb[1].mxu1 }
 0x23e   : > { %v845_v8 = vadd.f32 %v844_v1, %v767_v4 }
 0x23f   : > { %855 = vrot.lane.b32.xlu0 %v843_v0, %s2865_s29  ;;  %859 = vrot.lane.b32.xlu1 %v843_v0, %s2866_s25 }
 0x240   : > { %2446 = vmatprep.mubr.msk.f32.mxu1 %vm891_vm2, %v843_v0  ;;  %v848_v5 = vpop.f32.mrb[2].mxu1 }
 0x241   : > { %v849_v6 = vadd.f32 %v848_v5, %v763_v61  ;;  %v850_v7 = vpop.f32.mrb[3].mxu1 }
 0x242   : > { %v851_v9 = vadd.f32 %v850_v7, %v767_v4 }
 0x243   : > { %863 = vrot.lane.b32.xlu0 %v843_v0, %s2867_s30  ;;  %857 = vrot.lane.b32.xlu1 %v849_v6, %s2865_s29  ;;  %v2751_v12 = vpack.i.bf16 %v849_v6, %v843_v0 }
 0x244   : > { %v2630_v10 = vpack.c.bf16 %v851_v9, %v845_v8  ;;  %v3083_v11 = vpack.i.bf16 %v851_v9, %v845_v8 }
 0x247   : > { %2752 = vrot.lane.b32.xlu0 %v2751_v12, %s2868_s0  ;;  %861 = vrot.lane.b32.xlu1 %v849_v6, %s2866_s25 }
 0x24b   : > { %865 = vrot.lane.b32.xlu1 %v849_v6, %s2867_s30 }
 0x2b1   : > { %v860_v13 = vpop.permute.xlu1 %859  ;;  %v856_v14 = vpop.permute.xlu0 %855 }
 0x2b2   : > { %2460 = vmatprep.mubr.msk.f32.mxu0 %vm891_vm2, %v860_v13 }
 0x2b5   : > { %v858_v15 = vpop.permute.xlu1 %857  ;;  %v864_v16 = vpop.permute.xlu0 %863 }
 0x2b6   : > { %v2756_v17 = vpack.i.bf16 %v858_v15, %v856_v14 }
 0x2b8   : > { %2757 = vrot.lane.b32.xlu1 %v2756_v17, %s2868_s0 }
 0x2b9   : > { %v862_v18 = vpop.permute.xlu1 %861  ;;  %v2753_v19 = vpop.permute.xlu0 %2752 }
 0x2ba   : > { %v2761_v20 = vpack.i.bf16 %v862_v18, %v860_v13  ;;  %v2755_v21 = vunpack.i.h.bf16 %v2753_v19  ;;  %v2754_v22 = vunpack.i.l.bf16 %v2753_v19 }
 0x2bc   : > { %v2606_v24 = vpack.c.bf16 %v2755_v21, %v2754_v22  ;;  %2762 = vrot.lane.b32.xlu0 %v2761_v20, %s2868_s0 }
 0x2bd   : > { %v866_v25 = vpop.permute.xlu1 %865 }
 0x2be   : > { %v2766_v26 = vpack.i.bf16 %v866_v25, %v864_v16  ;;  %2608 = vmatprep.subr.msk.bf16.mxu1 %vm3090_vm3, %v2606_v24 }
 0x2bf   : > { %2611 = vmatpush3.bf16.xpose.msk.msra.mxu1 %vm3090_vm3, %v2606_v24 }
 0x2c0   : > { %2767 = vrot.lane.b32.xlu1 %v2766_v26, %s2868_s0 }
 0x2c6   : > { %2447 = vmatmul.mubr.msk.f32.vlgmr.msra.gmra.mrb[4].mxu1 %vm891_vm2, %v849_v6 }
 0x2c7   : > { %2453 = vmatprep.mubr.msk.f32.mxu1 %vm891_vm2, %v856_v14 }
 0x32a   : > { %v2758_v27 = vpop.permute.xlu1 %2757 }
 0x32b   : > { %v2760_v28 = vunpack.i.h.bf16 %v2758_v27  ;;  %v2759_v29 = vunpack.i.l.bf16 %v2758_v27 }
 0x32d   : > { %v2612_v30 = vpack.c.bf16 %v2760_v28, %v2759_v29 }
 0x32e   : > { %v2763_v31 = vpop.permute.xlu0 %2762 }
 0x32f   : > { %v2765_v32 = vunpack.i.h.bf16 %v2763_v31  ;;  %v2764_v33 = vunpack.i.l.bf16 %v2763_v31  ;;  %2614 = vmatprep.subr.msk.bf16.mxu1 %vm3090_vm3, %v2612_v30 }
 0x330   : > { %2617 = vmatpush3.bf16.xpose.msk.msra.mxu1 %vm3090_vm3, %v2612_v30 }
 0x331   : > { %v2618_v34 = vpack.c.bf16 %v2765_v32, %v2764_v33 }
 0x332   : > { %v2768_v35 = vpop.permute.xlu1 %2767 }
 0x333   : > { %v2770_v36 = vunpack.i.h.bf16 %v2768_v35  ;;  %v2769_v37 = vunpack.i.l.bf16 %v2768_v35  ;;  %2620 = vmatprep.subr.msk.bf16.mxu0 %vm3090_vm3, %v2618_v34 }
 0x334   : > { %2623 = vmatpush3.bf16.xpose.msk.msra.mxu0 %vm3090_vm3, %v2618_v34 }
 0x335   : > { %v2624_v38 = vpack.c.bf16 %v2770_v36, %v2769_v37  ;;  %2631 = vmatprep.subr.bf16.mxu0 %v2630_v10 }
 0x337   : > { %2454 = vmatmul.mubr.msk.f32.vlgmr.msra.gmra.mrb[6].mxu1 %vm891_vm2, %v858_v15  ;;  %2626 = vmatprep.subr.msk.bf16.mxu1 %vm3090_vm3, %v2624_v38 }
 0x338   : > { %2629 = vmatpush3.bf16.xpose.msk.msra.mxu1 %vm3090_vm3, %v2624_v38  ;;  %2467 = vmatprep.mubr.msk.f32.mxu1 %vm891_vm2, %v864_v16 }
 0x33b   : > { %2461 = vmatmul.mubr.msk.f32.vlgmr.msra.gmra.mrb[0].mxu0 %vm891_vm2, %v862_v18 }
 0x33c   : > { %2633 = vmatpush3.bf16.msra.mxu0 %v2630_v10 }
 0x33f   : > { %2468 = vmatmul.mubr.msk.f32.vlgmr.msra.gmra.mrb[8].mxu1 %vm891_vm2, %v866_v25 }
 0x399   : > { %v2448_v39 = vpop.f32.mrb[4].mxu1 }
 0x39a   : > { %v1237_v41 = vmul.f32 0.25, %v2448_v39  ;;  %v966_v42 = vpop.f32.mrb[5].mxu1 }
 0x39b   : > { %v1236_v44 = vmul.f32 0.25, %v966_v42 }
 0x39c   : > { %v1245_v45 = vadd.f32 %v1237_v41, %v695_v40 }
 0x39d   : > { %v1244_v46 = vadd.f32 %v1236_v44, %v694_v43 }
 0x39e   : > { %v1255_v47 = vsel %vm891_vm2, %v1245_v45, -inf }
 0x39f   : > { %1256 = vmax.xlane.f32.xlu1 %v1255_v47  ;;  %v1252_v48 = vsel %vm891_vm2, %v1244_v46, -inf }
 0x3a0   : > { %1253 = vmax.xlane.f32.xlu0 %v1252_v48 }
 0x40a   : > { %v2455_v49 = vpop.f32.mrb[6].mxu1 }
 0x40b   : > { %v1239_v50 = vmul.f32 0.25, %v2455_v49  ;;  %v1053_v51 = vpop.f32.mrb[7].mxu1 }
 0x40c   : > { %v1238_v52 = vmul.f32 0.25, %v1053_v51 }
 0x40d   : > { %v1247_v53 = vadd.f32 %v1239_v50, %v695_v40 }
 0x40e   : > { %v2462_v54 = vpop.f32.mrb[0].mxu0  ;;  %v1246_v58 = vadd.f32 %v1238_v52, %v694_v43 }
 0x40f   : > { %v1241_v55 = vmul.f32 0.25, %v2462_v54  ;;  %v1140_v56 = vpop.f32.mrb[1].mxu0  ;;  %v1261_v57 = vsel %vm891_vm2, %v1247_v53, -inf }
 0x410   : > { %v1240_v59 = vmul.f32 0.25, %v1140_v56  ;;  %1262 = vmax.xlane.f32.xlu0 %v1261_v57  ;;  %v1258_v1 = vsel %vm891_vm2, %v1246_v58, -inf }
 0x411   : > { %v1249_v60 = vadd.f32 %v1241_v55, %v695_v40 }
 0x412   : > { %v2469_v61 = vpop.f32.mrb[8].mxu1  ;;  %v1248_v4 = vadd.f32 %v1240_v59, %v694_v43 }
 0x413   : > { %v1243_v62 = vmul.f32 0.25, %v2469_v61  ;;  %v1227_v63 = vpop.f32.mrb[9].mxu1  ;;  %v1267_v0 = vsel %vm891_vm2, %v1249_v60, -inf }
 0x414   : > { %v1242_v5 = vmul.f32 0.25, %v1227_v63  ;;  %1268 = vmax.xlane.f32.xlu1 %v1267_v0  ;;  %1259 = vmax.xlane.f32.xlu0 %v1258_v1  ;;  %v1264_v7 = vsel %vm891_vm2, %v1248_v4, -inf }
 0x415   : > { %v1251_v6 = vadd.f32 %v1243_v62, %v695_v40 }
 0x416   : > { %v1250_v9 = vadd.f32 %v1242_v5, %v694_v43 }
 0x417   : > { %v1273_v8 = vsel %vm891_vm2, %v1251_v6, -inf }
 0x418   : > { %1265 = vmax.xlane.f32.xlu0 %v1264_v7  ;;  %1274 = vmax.xlane.f32.xlu1 %v1273_v8  ;;  %v1270_v10 = vsel %vm891_vm2, %v1250_v9, -inf }
 0x41c   : > { %1271 = vmax.xlane.f32.xlu0 %v1270_v10 }
 0x42c   : > { %v1257_v12 = vpop.xlane.xlu1 %1256 }
 0x42d   : > { %v1277_v13 = vsub.f32 %v1245_v45, %v1257_v12  ;;  %v1254_v14 = vpop.xlane.xlu0 %1253 }
 0x42e   : > { %v1276_v15 = vsub.f32 %v1244_v46, %v1254_v14 }
 0x42f   : > { %v1286_v16 = vmul.f32 1.442695, %v1277_v13 }
 0x430   : > { %v1284_v17 = vmul.f32 1.442695, %v1276_v15 }
 0x431   : > { %2790 = vpow2.f32 %v1286_v16 }
 0x432   : > { %2792 = vpow2.f32 %v1284_v17 }
 0x43b   : > { %v2791_v18 = vpop.eup %2790 }
 0x43c   : > { %v2793_v19 = vpop.eup %2792  ;;  %v1303_v20 = vsel %vm891_vm2, %v2791_v18, 0.0 }
 0x43d   : > { %1304 = vadd.xlane.f32.xlu1 %v1303_v20  ;;  %v1300_v21 = vsel %vm891_vm2, %v2793_v19, 0.0 }
 0x43e   : > { %1301 = vadd.xlane.f32.xlu0 %v1300_v21 }
 0x49d   : > { %v1263_v22 = vpop.xlane.xlu0 %1262 }
 0x49e   : > { %v1279_v23 = vsub.f32 %v1247_v53, %v1263_v22 }
 0x4a0   : > { %v1290_v24 = vmul.f32 1.442695, %v1279_v23 }
 0x4a1   : > { %v1269_v25 = vpop.xlane.xlu1 %1268  ;;  %v1260_v26 = vpop.xlane.xlu0 %1259 }
 0x4a2   : > { %2794 = vpow2.f32 %v1290_v24  ;;  %v1281_v27 = vsub.f32 %v1249_v60, %v1269_v25  ;;  %v1278_v28 = vsub.f32 %v1246_v58, %v1260_v26 }
 0x4a4   : > { %v1294_v29 = vmul.f32 1.442695, %v1281_v27  ;;  %v1288_v30 = vmul.f32 1.442695, %v1278_v28  ;;  %v1696_v28 = vld [vmem:[%s2994_s15] sm:$0xff] }
 0x4a5   : > { %v1266_v31 = vpop.xlane.xlu0 %1265  ;;  %v1275_v32 = vpop.xlane.xlu1 %1274 }
 0x4a6   : > { %2796 = vpow2.f32 %v1294_v29  ;;  %v1280_v33 = vsub.f32 %v1248_v4, %v1266_v31  ;;  %v1283_v34 = vsub.f32 %v1251_v6, %v1275_v32  ;;  %v1697_v29 = vld [vmem:[%s2994_s15 + $0x8] sm:$0xff]  ;;  %v1699_v32 = vld [vmem:[%s2994_s15 + $0x18] sm:$0xff] }
 0x4a7   : > { %2798 = vpow2.f32 %v1288_v30  ;;  %v1698_v30 = vld [vmem:[%s2994_s15 + $0x10] sm:$0xff]  ;;  %v2646_v31 = vpack.c.bf16 %v1697_v29, %v1696_v28  ;;  %v1939_v29 = vld [vmem:[%s3024_s27 + $0x18] sm:$0xff] }
 0x4a8   : > { %v1292_v35 = vmul.f32 1.442695, %v1280_v33  ;;  %v1298_v36 = vmul.f32 1.442695, %v1283_v34  ;;  %v2650_v33 = vpack.c.bf16 %v1699_v32, %v1698_v30  ;;  %v1700_v34 = vld [vmem:[%s2994_s15 + $0x20] sm:$0xff]  ;;  %v1941_v32 = vld [vmem:[%s3024_s27 + $0x28] sm:$0xff] }
 0x4a9   : > { %v1272_v37 = vpop.xlane.xlu0 %1271 }
 0x4aa   : > { %2800 = vpow2.f32 %v1292_v35  ;;  %v1282_v38 = vsub.f32 %v1250_v9, %v1272_v37  ;;  %v1701_v35 = vld [vmem:[%s2994_s15 + $0x28] sm:$0xff]  ;;  %v1702_v37 = vld [vmem:[%s2994_s15 + $0x30] sm:$0xff] }
 0x4ab   : > { %2802 = vpow2.f32 %v1298_v36  ;;  %v2654_v36 = vpack.c.bf16 %v1701_v35, %v1700_v34  ;;  %v1942_v34 = vld [vmem:[%s3024_s27 + $0x30] sm:$0xff]  ;;  %v1943_v35 = vld [vmem:[%s3024_s27 + $0x38] sm:$0xff] }
 0x4ac   : > { %v3132_v39 = vpop.eup %2794  ;;  %v1296_v40 = vmul.f32 1.442695, %v1282_v38  ;;  %v1703_v38 = vld [vmem:[%s2994_s15 + $0x38] sm:$0xff] }
 0x4ad   : > { %v1309_v41 = vsel %vm891_vm2, %v3132_v39, 0.0 }
 0x4ae   : > { %2804 = vpow2.f32 %v1296_v40  ;;  %1310 = vadd.xlane.f32.xlu1 %v1309_v41 }
 0x4b0   : > { %v2797_v42 = vpop.eup %2796 }
 0x4b1   : > { %v2799_v43 = vpop.eup %2798  ;;  %v1315_v44 = vsel %vm891_vm2, %v2797_v42, 0.0 }
 0x4b2   : > { %1316 = vadd.xlane.f32.xlu1 %v1315_v44  ;;  %v1306_v45 = vsel %vm891_vm2, %v2799_v43, 0.0 }
 0x4b3   : > { %1307 = vadd.xlane.f32.xlu0 %v1306_v45 }
 0x4b4   : > { %v2801_v46 = vpop.eup %2800 }
 0x4b5   : > { %v3138_v47 = vpop.eup %2802  ;;  %v1312_v48 = vsel %vm891_vm2, %v2801_v46, 0.0 }
 0x4b6   : > { %v1321_v49 = vsel %vm891_vm2, %v3138_v47, 0.0 }
 0x4b7   : > { %1322 = vadd.xlane.f32.xlu1 %v1321_v49  ;;  %1313 = vadd.xlane.f32.xlu0 %v1312_v48 }
 0x4b8   : > { %v2805_v50 = vpop.eup %2804 }
 0x4b9   : > { %v1318_v51 = vsel %vm891_vm2, %v2805_v50, 0.0 }
 0x4bb   : > { %1319 = vadd.xlane.f32.xlu0 %v1318_v51 }
 0x4c8   : > { %2777 = vrot.lane.b32.xlu1 %v3083_v11, %s2866_s25 }
 0x4ca   : > { %v1305_v52 = vpop.xlane.xlu1 %1304 }
 0x4cb   : > { %2806 = vrcp.f32 %v1305_v52  ;;  %v1302_v53 = vpop.xlane.xlu0 %1301 }
 0x4cc   : > { %2782 = vrot.lane.b32.xlu1 %v3083_v11, %s2867_s30  ;;  %2808 = vrcp.f32 %v1302_v53  ;;  %s3349_s30 = scalar_lea.vmem %s3315_s8, %s2972_s23 }
 0x4d1   : > { %2772 = vrot.lane.b32.xlu0 %v3083_v11, %s2865_s29  ;;  %s3348_s29 = scalar_lea.vmem %s3312_s5, %s2972_s23 }
 0x4d5   : > { %v2807_v54 = vpop.eup %2806 }
 0x4d6   : > { %v2809_v55 = vpop.eup %2808  ;;  %v1333_v57 = vmul.f32 %v2807_v54, %v2791_v18 }
 0x4d7   : > { %v1332_v56 = vmul.f32 %v2809_v55, %v2793_v19 }
 0x4d9   : > { %2474 = vmatprep.mubr.msk.f32.mxu0 %vm891_vm2, %v1332_v56 }
 0x4da   : > { %2475 = vmatmul.mubr.msk.f32.vlgmr.msra.gmra.mrb[2].mxu0 %vm891_vm2, %v1333_v57 }
 0x53b   : > { %v1311_v58 = vpop.xlane.xlu1 %1310 }
 0x53f   : > { %v1317_v59 = vpop.xlane.xlu1 %1316 }
 0x540   : > { %v1308_v60 = vpop.xlane.xlu0 %1307 }
 0x541   : > { %2810 = vrcp.f32 %v1308_v60 }
 0x542   : > { %2812 = vrcp.f32 %v1311_v58  ;;  %v2341_v58 = vld [vmem:[%s3348_s29] ss:$0 sm:$0xff] }
 0x543   : > { %2814 = vrcp.f32 %v1317_v59 }
 0x544   : > { %v1323_v61 = vpop.xlane.xlu1 %1322  ;;  %v1314_v62 = vpop.xlane.xlu0 %1313 }
 0x545   : > { %2816 = vrcp.f32 %v1314_v62 }
 0x548   : > { %v2778_v63 = vpop.permute.xlu1 %2777  ;;  %v1320_v0 = vpop.xlane.xlu0 %1319 }
 0x549   : > { %v2780_v11 = vunpack.i.h.bf16 %v2778_v63  ;;  %v2779_v1 = vunpack.i.l.bf16 %v2778_v63  ;;  %2818 = vrcp.f32 %v1320_v0 }
 0x54a   : > { %2820 = vrcp.f32 %v1323_v61 }
 0x54b   : > { %v2811_v4 = vpop.eup %2810  ;;  %v2638_v5 = vpack.c.bf16 %v2780_v11, %v2779_v1 }
 0x54c   : > { %v2783_v6 = vpop.permute.xlu1 %2782  ;;  %v2773_v7 = vpop.permute.xlu0 %2772  ;;  %v1334_v8 = vmul.f32 %v2811_v4, %v2799_v43 }
 0x54d   : > { %v2785_v9 = vunpack.i.h.bf16 %v2783_v6  ;;  %v2784_v10 = vunpack.i.l.bf16 %v2783_v6  ;;  %v2775_v12 = vunpack.i.h.bf16 %v2773_v7  ;;  %v2774_v13 = vunpack.i.l.bf16 %v2773_v7  ;;  %2639 = vmatprep.subr.bf16.mxu0 %v2638_v5  ;;  %v2813_v14 = vpop.eup %2812 }
 0x54e   : > { %2481 = vmatprep.mubr.msk.f32.mxu1 %vm891_vm2, %v1334_v8  ;;  %2641 = vmatpush3.bf16.msra.mxu0 %v2638_v5  ;;  %v2815_v15 = vpop.eup %2814  ;;  %v1335_v22 = vmul.f32 %v2813_v14, %v3132_v39  ;;  %v2658_v39 = vpack.c.bf16 %v1703_v38, %v1702_v37  ;;  %v1839_v14 = vld [vmem:[%s3015_s21 + $0x8] sm:$0xff]  ;;  %v1944_v37 = vld [vmem:[%s3024_s27 + $0x40] sm:$0xff] }
 0x54f   : > { %v2634_v16 = vpack.c.bf16 %v2775_v12, %v2774_v13  ;;  %v2817_v17 = vpop.eup %2816  ;;  %v2642_v18 = vpack.c.bf16 %v2785_v9, %v2784_v10  ;;  %v1337_v20 = vmul.f32 %v2815_v15, %v2797_v42  ;;  %2647 = vmatprep.subr.bf16.mxu0 %v2646_v31  ;;  %v1838_v13 = vld [vmem:[%s3015_s21] sm:$0xff]  ;;  %v1945_v38 = vld [vmem:[%s3024_s27 + $0x48] sm:$0xff] }
 0x550   : > { %v1336_v19 = vmul.f32 %v2817_v17, %v2801_v46  ;;  %v2662_v15 = vpack.c.bf16 %v1839_v14, %v1838_v13  ;;  %v1841_v17 = vld [vmem:[%s3015_s21 + $0x18] sm:$0xff] }
 0x551   : > { %2635 = vmatprep.subr.bf16.mxu1 %v2634_v16 }
 0x552   : > { %2637 = vmatpush3.bf16.msra.mxu1 %v2634_v16  ;;  %2488 = vmatprep.mubr.msk.f32.mxu0 %vm891_vm2, %v1336_v19  ;;  %v1840_v16 = vld [vmem:[%s3015_s21 + $0x10] sm:$0xff]  ;;  %v1842_v19 = vld [vmem:[%s3015_s21 + $0x20] sm:$0xff] }
 0x553   : > { %v2819_v21 = vpop.eup %2818  ;;  %2643 = vmatprep.subr.bf16.mxu1 %v2642_v18  ;;  %2489 = vmatmul.mubr.msk.f32.vlgmr.msra.gmra.mrb[4].mxu0 %vm891_vm2, %v1337_v20  ;;  %v1843_v20 = vld [vmem:[%s3015_s21 + $0x28] sm:$0xff] }
 0x554   : > { %v2821_v23 = vpop.eup %2820  ;;  %v1338_v24 = vmul.f32 %v2819_v21, %v2805_v50  ;;  %2649 = vmatpush3.bf16.msra.mxu0 %v2646_v31  ;;  %v2670_v21 = vpack.c.bf16 %v1843_v20, %v1842_v19  ;;  %v1940_v31 = vld [vmem:[%s3024_s27 + $0x20] sm:$0xff] }
 0x555   : > { %2482 = vmatmul.mubr.msk.f32.vlgmr.msra.gmra.mrb[10].mxu1 %vm891_vm2, %v1335_v22  ;;  %v1339_v25 = vmul.f32 %v2821_v23, %v3138_v47  ;;  %2651 = vmatprep.subr.bf16.mxu0 %v2650_v33  ;;  %v1844_v22 = vld [vmem:[%s3015_s21 + $0x30] sm:$0xff]  ;;  %v1845_v23 = vld [vmem:[%s3015_s21 + $0x38] sm:$0xff] }
 0x556   : > { %2645 = vmatpush3.bf16.msra.mxu1 %v2642_v18  ;;  %2495 = vmatprep.mubr.msk.f32.mxu1 %vm891_vm2, %v1338_v24  ;;  %v2666_v18 = vpack.c.bf16 %v1841_v17, %v1840_v16  ;;  %v2674_v24 = vpack.c.bf16 %v1845_v23, %v1844_v22 }
 0x557   : > { %2663 = vmatprep.subr.bf16.mxu1 %v2662_v15 }
 0x558   : > { %2653 = vmatpush3.bf16.msra.mxu0 %v2650_v33  ;;  %v2686_v33 = vpack.c.bf16 %v1941_v32, %v1940_v31 }
 0x559   : > { %2496 = vmatmul.mubr.msk.f32.vlgmr.msra.gmra.mrb[12].mxu1 %vm891_vm2, %v1339_v25  ;;  %2655 = vmatprep.subr.bf16.mxu0 %v2654_v36  ;;  %v1936_v25 = vld [vmem:[%s3024_s27] sm:$0xff] }
 0x55a   : > { %2665 = vmatpush3.bf16.msra.mxu1 %v2662_v15 }
 0x55b   : > { %2667 = vmatprep.subr.bf16.mxu1 %v2666_v18 }
 0x55c   : > { %2657 = vmatpush3.bf16.msra.mxu0 %v2654_v36  ;;  %v2690_v36 = vpack.c.bf16 %v1943_v35, %v1942_v34 }
 0x55d   : > { %2659 = vmatprep.subr.bf16.mxu0 %v2658_v39 }
 0x55e   : > { %2669 = vmatpush3.bf16.msra.mxu1 %v2666_v18 }
 0x55f   : > { %2671 = vmatprep.subr.bf16.mxu1 %v2670_v21 }
 0x560   : > { %2661 = vmatpush3.bf16.msra.mxu0 %v2658_v39  ;;  %v2694_v39 = vpack.c.bf16 %v1945_v38, %v1944_v37 }
 0x562   : > { %2673 = vmatpush3.bf16.msra.mxu1 %v2670_v21 }
 0x563   : > { %2675 = vmatprep.subr.bf16.mxu1 %v2674_v24 }
 0x566   : > { %2677 = vmatpush3.bf16.msra.mxu1 %v2674_v24 }
 0x5ad   : > { %v2476_v26 = vpop.f32.mrb[2].mxu0 }
 0x5ae   : > { %v1412_v27 = vpop.f32.mrb[3].mxu0 }
 0x626   : > { %v2490_v40 = vpop.f32.mrb[4].mxu0 }
 0x627   : > { %v1574_v41 = vpop.f32.mrb[5].mxu0 }
 0x628   : > { %v2483_v42 = vpop.f32.mrb[10].mxu1 }
 0x629   : > { %1668 = vrot.lane.b32.xlu0 %v2483_v42, %s2869_s16  ;;  %v1493_v43 = vpop.f32.mrb[11].mxu1 }
 0x62a   : > { %1666 = vrot.lane.b32.xlu1 %v1493_v43, %s2869_s16  ;;  %v1948_v43 = vld [vmem:[%s3024_s27 + $0x60] sm:$0xff]  ;;  %s3350_s16 = sld [smem:[#allocation13_spill]] (!%p2350_p5) }
 0x62c   : > { %v2497_v44 = vpop.f32.mrb[12].mxu1 }
 0x62d   : > { %1676 = vrot.lane.b32.xlu0 %v2490_v40, %s2870_s1  ;;  %v1655_v45 = vpop.f32.mrb[13].mxu1  ;;  %v1946_v40 = vld [vmem:[%s3024_s27 + $0x50] sm:$0xff] }
 0x62e   : > { %1674 = vrot.lane.b32.xlu1 %v1574_v41, %s2870_s1  ;;  %v1947_v41 = vld [vmem:[%s3024_s27 + $0x58] sm:$0xff] }
 0x62f   : > { %v2698_v42 = vpack.c.bf16 %v1947_v41, %v1946_v40 }
 0x630   : > { %v2042_v17 = vld [vmem:[%s3350_s16] sm:$0xff] (!%p2350_p5)  ;;  %v2043_v18 = vld [vmem:[%s3350_s16 + $0x8] sm:$0xff] (!%p2350_p5)  ;;  %v2045_v19 = vld [vmem:[%s3350_s16 + $0x18] sm:$0xff] (!%p2350_p5) }
 0x631   : > { %1684 = vrot.lane.b32.xlu0 %v2497_v44, %s2871_s28  ;;  %v1949_v44 = vld [vmem:[%s3024_s27 + $0x68] sm:$0xff]  ;;  %v2046_v21 = vld [vmem:[%s3350_s16 + $0x20] sm:$0xff] (!%p2350_p5)  ;;  %v2048_v24 = vld [vmem:[%s3350_s16 + $0x30] sm:$0xff] (!%p2350_p5) }
 0x632   : > { %1682 = vrot.lane.b32.xlu1 %v1655_v45, %s2871_s28  ;;  %v2702_v45 = vpack.c.bf16 %v1949_v44, %v1948_v43  ;;  %v2047_v22 = vld [vmem:[%s3350_s16 + $0x28] sm:$0xff] (!%p2350_p5) }
 0x633   : > { %v2718_v23 = vpack.c.bf16 (!%p2350_p5), %v2047_v22, %v2046_v21 }
 0x69b   : > { %v1669_v46 = vpop.permute.xlu0 %1668 }
 0x69c   : > { %v1667_v47 = vpop.permute.xlu1 %1666  ;;  %v1689_v52 = vsel %vm891_vm2, %v2476_v26, %v1669_v46  ;;  %v1937_v26 = vld [vmem:[%s3024_s27 + $0x8] sm:$0xff] }
 0x69d   : > { %v1688_v50 = vsel %vm891_vm2, %v1412_v27, %v1667_v47  ;;  %v1938_v27 = vld [vmem:[%s3024_s27 + $0x10] sm:$0xff]  ;;  %v2678_v28 = vpack.c.bf16 %v1937_v26, %v1936_v25  ;;  %v2049_v25 = vld [vmem:[%s3350_s16 + $0x38] sm:$0xff] (!%p2350_p5) }
 0x69e   : > { %v2682_v30 = vpack.c.bf16 %v1939_v29, %v1938_v27  ;;  %v2722_v26 = vpack.c.bf16 (!%p2350_p5), %v2049_v25, %v2048_v24 }
 0x69f   : > { %v1677_v48 = vpop.permute.xlu0 %1676  ;;  %2679 = vmatprep.subr.bf16.mxu0 %v2678_v28 }
 0x6a0   : > { %v1675_v49 = vpop.permute.xlu1 %1674  ;;  %v1692_v55 = vsel %vm1690_vm4, %v1689_v52, %v1677_v48 }
 0x6a1   : > { %v1691_v53 = vsel %vm1690_vm4, %v1688_v50, %v1675_v49 }
 0x6a3   : > { %v1685_v51 = vpop.permute.xlu0 %1684 }
 0x6a4   : > { %v1683_v54 = vpop.permute.xlu1 %1682  ;;  %v1695_v57 = vsel %vm1693_vm5, %v1692_v55, %v1685_v51  ;;  %v2345_v55 = vld [vmem:[%s666_s19] ss:$0 sm:$0xff] }
 0x6a5   : > { %v1694_v56 = vsel %vm1693_vm5, %v1691_v53, %v1683_v54  ;;  %v2344_v53 = vld [vmem:[%s3349_s30] ss:$0 sm:$0xff] }
 0x6a6   : > { %2514 = vmatprep.mubr.msk.f32.mxu0 %vm698_vm1, %v1694_v56 }
 0x6a7   : > { %2515 = vmatmul.mubr.msk.f32.vlgmr.msra.gmra.mrb[6].mxu0 %vm698_vm1, %v1695_v57 }
 0x6a8   : > { %2681 = vmatpush3.bf16.msra.mxu0 %v2678_v28 }
 0x6a9   : > { %2683 = vmatprep.subr.bf16.mxu0 %v2682_v30 }
 0x6ac   : > { %2685 = vmatpush3.bf16.msra.mxu0 %v2682_v30 }
 0x6ad   : > { %2687 = vmatprep.subr.bf16.mxu0 %v2686_v33 }
 0x6b0   : > { %2689 = vmatpush3.bf16.msra.mxu0 %v2686_v33 }
 0x6b1   : > { %2691 = vmatprep.subr.bf16.mxu0 %v2690_v36 }
 0x6b4   : > { %2693 = vmatpush3.bf16.msra.mxu0 %v2690_v36 }
 0x6b5   : > { %2695 = vmatprep.subr.bf16.mxu0 %v2694_v39 }
 0x6b8   : > { %2697 = vmatpush3.bf16.msra.mxu0 %v2694_v39 }
 0x6b9   : > { %2699 = vmatprep.subr.bf16.mxu0 %v2698_v42 }
 0x6bc   : > { %2701 = vmatpush3.bf16.msra.mxu0 %v2698_v42 }
 0x6bd   : > { %2703 = vmatprep.subr.bf16.mxu0 %v2702_v45 }
 0x6c0   : > { %2705 = vmatpush3.bf16.msra.mxu0 %v2702_v45 }
 0x77a   : > { %v2516_v59 = vpop.f32.mrb[6].mxu0 }
 0x77b   : > { %v1789_v60 = vadd.f32 %v2516_v59, %v2341_v58  ;;  %v1783_v61 = vpop.f32.mrb[7].mxu0 }
 0x77c   : > { %v1784_v62 = vadd.f32 %v2341_v58, %v1783_v61 }
 0x77d   : > { %v3178_v63 = vadd.f32 %v1789_v60, %v3039_v3 }
 0x77e   : > { %v3181_v0 = vadd.f32 %v1784_v62, %v3037_v2  ;;  %v1950_v62 = vld [vmem:[%s3024_s27 + $0x70] sm:$0xff] }
 0x77f   : > { %v1799_v11 = vsel %vm698_vm1, %v3178_v63, 0.0 }
 0x780   : > { %1800 = vadd.xlane.f32.xlu0 %v1799_v11  ;;  %v1796_v1 = vsel %vm698_vm1, %v3181_v0, 0.0  ;;  %v1951_v11 = vld [vmem:[%s3024_s27 + $0x78] sm:$0xff] }
 0x781   : > { %1797 = vadd.xlane.f32.xlu1 %v1796_v1  ;;  %v2706_v1 = vpack.c.bf16 %v1951_v11, %v1950_v62 }
 0x783   : > { %2707 = vmatprep.subr.bf16.mxu0 %v2706_v1 }
 0x784   : > { %2709 = vmatpush3.bf16.msra.mxu0 %v2706_v1 }
 0x80d   : > { %v1801_v4 = vpop.xlane.xlu0 %1800 }
 0x80e   : > { %v1803_v5 = vmul.f32 0.015625, %v1801_v4  ;;  %v1798_v6 = vpop.xlane.xlu1 %1797  ;;  %v2346_v4 = vld [vmem:[%s674_s14] ss:$0 sm:$0xff]  ;;  %s3351_s14 = sld [smem:[#allocation14_spill]] (!%p2350_p5) }
 0x80f   : > { %v1802_v3 = vmul.f32 0.015625, %v1798_v6 }
 0x810   : > { %v3188_v7 = vsub.f32 %v3178_v63, %v1803_v5 }
 0x811   : > { %v3191_v2 = vsub.f32 %v3181_v0, %v1802_v3 }
 0x812   : > { %v1807_v10 = vmul.f32 %v3188_v7, %v3188_v7 }
 0x813   : > { %v1806_v8 = vmul.f32 %v3191_v2, %v3191_v2 }
 0x814   : > { %v1811_v12 = vsel %vm698_vm1, %v1807_v10, 0.0  ;;  %v2351_v27 = vld [vmem:[%s3351_s14] ss:$0 sm:$0xff] (!%p2350_p5) }
 0x815   : > { %v1808_v9 = vsel %vm698_vm1, %v1806_v8, 0.0 }
 0x816   : > { %1809 = vadd.xlane.f32.xlu0 %v1808_v9  ;;  %v2349_v9 = vld [vmem:[%s682_s3] ss:$0 sm:$0xff] }
 0x81a   : > { %1812 = vadd.xlane.f32.xlu0 %v1811_v12 }
 0x8a3   : > { %v1810_v46 = vpop.xlane.xlu0 %1809 }
 0x8a4   : > { %v1814_v47 = vmul.f32 0.015625, %v1810_v46 }
 0x8a6   : > { %v1816_v48 = vadd.f32 1e-05, %v1814_v47 }
 0x8a7   : > { %v1813_v49 = vpop.xlane.xlu0 %1812 }
 0x8a8   : > { %2822 = vrsqrt.f32 %v1816_v48  ;;  %v1815_v50 = vmul.f32 0.015625, %v1813_v49 }
 0x8aa   : > { %v1817_v51 = vadd.f32 1e-05, %v1815_v50 }
 0x8ac   : > { %2824 = vrsqrt.f32 %v1817_v51 }
 0x8b2   : > { %v2823_v52 = vpop.eup %2822 }
 0x8b3   : > { %v1820_v54 = vmul.f32 %v2823_v52, %v3191_v2 }
 0x8b5   : > { %v1828_v56 = vmul.f32 %v2344_v53, %v1820_v54 }
 0x8b6   : > { %v2825_v57 = vpop.eup %2824 }
 0x8b7   : > { %v1821_v58 = vmul.f32 %v2825_v57, %v3188_v7  ;;  %v1836_v59 = vadd.f32 %v2345_v55, %v1828_v56 }
 0x8b9   : > { %v1829_v60 = vmul.f32 %v2344_v53, %v1821_v58  ;;  %2533 = vmatprep.mubr.msk.f32.mxu1 %vm698_vm1, %v1836_v59 }
 0x8bb   : > { %v1837_v61 = vadd.f32 %v2345_v55, %v1829_v60 }
 0x8bd   : > { %2534 = vmatmul.mubr.msk.f32.vlgmr.msra.gmra.mrb[14].mxu1 %vm698_vm1, %v1837_v61 }
 0x990   : > { %v2535_v5 = vpop.f32.mrb[14].mxu1 }
 0x991   : > { %v1931_v6 = vadd.f32 %v2535_v5, %v2346_v4  ;;  %v1925_v3 = vpop.f32.mrb[15].mxu1 }
 0x992   : > { %v1926_v7 = vadd.f32 %v2346_v4, %v1925_v3 }
 0x993   : > { %v1935_v8 = vmax.f32 %v1931_v6, 0.0 }
 0x994   : > { %v1934_v2 = vmax.f32 %v1926_v7, 0.0 }
 0x996   : > { %2568 = vmatprep.mubr.f32.mxu0 %v1934_v2 }
 0x997   : > { %2569 = vmatmul.mubr.f32.vlgmr.msra.gmra.mrb[8].mxu0 %v1935_v8 }
 0xa6a   : > { %v2570_v10 = vpop.f32.mrb[8].mxu0  ;;  %2041 = sbr.rel (%p2350_p5) target bundleno = 2904 (0xb58), region = 92 }
 0xa6b   : > { %v2031_v12 = vadd.f32 %v2570_v10, %v2349_v9  ;;  %v2025_v13 = vpop.f32.mrb[9].mxu0 }
 0xa6c   : > { %v2026_v14 = vadd.f32 %v2349_v9, %v2025_v13 }
 0xa6d   : > { %v2035_v15 = vadd.f32 %v2031_v12, %v3178_v63  ;;  %v2044_v63 = vld [vmem:[%s3350_s16 + $0x10] sm:$0xff] (!%p2350_p5) }
 0xa6e   : > { %v2034_v16 = vadd.f32 %v2026_v14, %v3181_v0  ;;  %v2710_v0 = vpack.c.bf16 (!%p2350_p5), %v2043_v18, %v2042_v17  ;;  %v2714_v20 = vpack.c.bf16 (!%p2350_p5), %v2045_v19, %v2044_v63 }
 0xa6f   : > { %2037 = vst.msk [vmem:[#allocation2 + $0x8] sm:$0xff] %vm698_vm1, %v2035_v15 }
 0xa70   : > { %2036 = vst.msk [vmem:[#allocation2] sm:$0xff] %vm698_vm1, %v2034_v16  ;;  %2587 = vmatprep.mubr.msk.f32.mxu0 (!%p2350_p5), %vm698_vm1, %v2034_v16  ;;  %2711 = vmatprep.subr.bf16.mxu0 (!%p2350_p5), %v2710_v0 }
 0xa71   : > { %2713 = vmatpush3.bf16.msra.mxu0 %v2710_v0 }
 0xa72   : > { %2715 = vmatprep.subr.bf16.mxu0 %v2714_v20 }
 0xa75   : > { %2717 = vmatpush3.bf16.msra.mxu0 %v2714_v20 }
 0xa76   : > { %2719 = vmatprep.subr.bf16.mxu0 %v2718_v23 }
 0xa79   : > { %2721 = vmatpush3.bf16.msra.mxu0 %v2718_v23 }
 0xa7a   : > { %2723 = vmatprep.subr.bf16.mxu0 %v2722_v26 }
 0xa7d   : > { %2725 = vmatpush3.bf16.msra.mxu0 %v2722_v26 }
 0xa80   : > { %2588 = vmatmul.mubr.msk.f32.vlgmr.msra.gmra.mrb[0].mxu0 %vm698_vm1, %v2035_v15 }
 0xb53   : > { %v2589_v28 = vpop.f32.mrb[0].mxu0 }
 0xb54   : > { %v2135_v29 = vadd.f32 %v2589_v28, %v2351_v27  ;;  %v2129_v30 = vpop.f32.mrb[1].mxu0 }
 0xb55   : > { %v2130_v31 = vadd.f32 %v2351_v27, %v2129_v30 }
 0xb56   : > { %2139 = vst [vmem:[#allocation3 + $0x8] sm:$0xff] %v2135_v29 }
 0xb57   : > { %2138 = vst [vmem:[#allocation3] sm:$0xff] %v2130_v31 }
 0xb58 PF: > { %p2730_p6 = scmp.eq.s32.totalorder %s2966_s22, 1  ;;  %s2872_s27 = smov [#allocation3]  }
 0xb59   : > { %s2146_s3 = sshll.u32 %s2872_s27, 4  ;;  %s2147_s3 = int_to_ptr.vmem [resolvable:$true] %s2146_s3 }
 0xb5a   : > { %s2826_s23 = scalar_lea.vmem %s2147_s3, 256  ;;  %p2833_p10 = scmp.lt.s32.totalorder %s2147_s3, %s2147_s3 }
 0xb5b   : > { %p2827_p7 = scmp.ne.s32.totalorder %s2147_s3, %s2826_s23  ;;  %p2834_p11 = scmp.lt.s32.totalorder %s2826_s23, %s2826_s23 }
 0xb5d   : > { %p2828_p8 = pnand %p2827_p7, %p2730_p6  ;;  %p2835_p12 = por %p2834_p11, %p2833_p10 }
 0xb5f   : > { %p2829_p9 = pneg %p2828_p8 }
 0xb61   : > { %p2836_p13 = pnand %p2835_p12, %p2829_p9 }
 0xb63   : > { %2839 = shalt.err (!%p2836_p13)
}
 0xb64   : > { %s3352_s15 = sld [smem:[#allocation15_spill]] }
 0xb6a   : > { %s2840_s2 = scalar_lea.hbm %s3352_s15, 256 }
 0xb6b   : > { %p2841_p0 = scmp.ne.s32.totalorder %s3352_s15, %s2840_s2  ;;  %p2846_p3 = scmp.lt.u32.totalorder %s2840_s2, %s3352_s15 }
 0xb6d   : > { %p2842_p1 = pnand %p2841_p0, %p2730_p6 }
 0xb6f   : > { %p2843_p2 = pneg %p2842_p1 }
 0xb71   : > { %p2848_p4 = pnand %p2846_p3, %p2843_p2 }
 0xb73   : > { %2851 = shalt.err (!%p2848_p4)
}
 0xb74   : > { %s2873_s0 = smov 128   ;;  %s2874_s20 = smov 8  }
 0xb75   : > { %2727 = dma.vmem_to_hbm [thread:$0]  (%p2730_p6), %s2147_s3, 256, %s3352_s15, [#allocation4], %s2873_s0, %s2873_s0, %s2874_s20  }
 0xb76   : > { %2857 = dma.done.wait (%p2730_p6), [#allocation4], 256  }
 0xb77   : > { %2859 = vsyncadd (%p2730_p6), [#allocation4], 4294967040 }
 0xb78 PF: > { %s3353_s19 = sld [smem:[#allocation6_spill]] }
 0xb7e   : > { %s27_s21 = sadd.s32 1, %s3353_s19  }
 0xb7f   : > { %p24_p5 = scmp.ge.s32.totalorder %s27_s21, 4  }
 0xb81   :  { %26 = sbr.rel (!%p24_p5) target bundleno = 10 (0xa), region = 152 }
 0xb88   :  { %2162 = vsyncpa [#allocation4], 1 }
 0xb89   :  { %2164 = vsyncpa [#allocation4 + $0x1], 1 }

</bundles_post_ra>
